<compile_context>
chip_gen: v5e
topology: v5e:2x2
jax: 0.10.0
libtpu: 0.0.40
codegen_flags: <defaults>
</compile_context>

<pallas_src>
import jax
import jax.numpy as jnp
import numpy as np
from jax import lax
from jax.experimental import pallas as pl
from jax.experimental.pallas import tpu as pltpu


def aki_lstm_kernel(xf_ref, xmean_ref,          # (T*BP, D), (BP, D)
                    wih0_ref, b0_ref,           # (D, 4H), (1, 4H)
                    whh0_ref, wih1_ref, whh1_ref, b1_ref,   # (H,4H)x3, (1,4H)
                    wres_ref, bres_ref,         # (D, H), (1, H)
                    gamma_ref, beta_ref,        # (1, H), (1, H)
                    wfc_ref, bfc_ref,           # (H, CPAD), (1, CPAD)
                    out_ref):                   # (BP, CPAD)
    TB, D = xf_ref.shape
    H = whh0_ref.shape[0]
    B = out_ref.shape[0]          # padded batch (multiple of 8)
    T = TB // B
    H4 = 4 * H

    # ---- Hoisted layer-0 input projection for all timesteps: one 128-lane matmul.
    gate_in = (jnp.dot(xf_ref[...], wih0_ref[...],
                       preferred_element_type=jnp.float32) + b0_ref[...])

    # ---- Residual branch: single (B,D)@(D,H) matmul on the time-mean of x.
    # Independent of the recurrence, so the scheduler can overlap it.
    residual = (jnp.dot(xmean_ref[...], wres_ref[...],
                        preferred_element_type=jnp.float32) + bres_ref[...])

    whh0 = whh0_ref[...]
    whh1 = whh1_ref[...]
    wih1 = wih1_ref[...]
    b1b = jnp.broadcast_to(b1_ref[...], (B, H4))     # bias broadcast hoisted

    def gates(z):
        # sigmoid via tanh identity: one EUP tanh push on the full (B,4H) vreg
        # instead of exp + reciprocal; gate extraction is static lane slices.
        sg = 0.5 * (jnp.tanh(0.5 * z) + 1.0)
        th = jnp.tanh(z)
        i = sg[:, 0:H]
        f = sg[:, H:2 * H]
        g = th[:, 2 * H:3 * H]
        o = sg[:, 3 * H:4 * H]
        return i, f, g, o

    zero_h = jnp.zeros((B, H), jnp.float32)
    h0, c0, h1, c1 = zero_h, zero_h, zero_h, zero_h
    zrec0 = jnp.zeros((B, H4), jnp.float32)   # h0(t-1) @ whh0  (zero at t=0)
    zrec1 = jnp.zeros((B, H4), jnp.float32)   # h1(t-1) @ whh1  (zero at t=0)

    # ---- Fully unrolled time recurrence (T is small and static).
    for t in range(T):
        # Layer 0 cell — depends only on h0/c0(t-1); B=8 slice is tile-aligned.
        z0 = gate_in[t * B:(t + 1) * B, :] + zrec0
        i0, f0, g0, o0 = gates(z0)
        c0 = f0 * c0 + i0 * g0
        h0 = o0 * jnp.tanh(c0)
        # Issue layer-0's next-step recurrent projection as soon as h0(t) is
        # ready — it no longer waits on h1(t) (block-diag false dependency gone).
        if t + 1 < T:
            zrec0 = jnp.dot(h0, whh0, preferred_element_type=jnp.float32)

        # Layer 1 cell (inter-layer dropout is identity in eval mode).
        z1 = zrec1 + b1b + jnp.dot(h0, wih1, preferred_element_type=jnp.float32)
        i1, f1, g1, o1 = gates(z1)
        c1 = f1 * c1 + i1 * g1
        h1 = o1 * jnp.tanh(c1)
        if t + 1 < T:
            zrec1 = jnp.dot(h1, whh1, preferred_element_type=jnp.float32)

    h = h1 + residual

    # LayerNorm (eps=1e-5, biased variance) over the hidden dim.
    mu = jnp.mean(h, axis=-1, keepdims=True)
    var = jnp.mean((h - mu) ** 2, axis=-1, keepdims=True)
    h = (h - mu) * lax.rsqrt(var + 1e-5)
    h = h * gamma_ref[...] + beta_ref[...]

    # SiLU (sigmoid via tanh); Dropout -> identity in eval mode.
    h = h * (0.5 * (jnp.tanh(0.5 * h) + 1.0))

    # Lane-dense (BP, CPAD) store; caller slices [:B, :C].
    out_ref[...] = (jnp.dot(h, wfc_ref[...],
                            preferred_element_type=jnp.float32) + bfc_ref[...])


def make_params(key, input_size, hidden_size, num_classes):
    """Deterministic PyTorch-style uniform init for all module parameters."""
    ks = jax.random.split(key, 16)
    H, D, C = hidden_size, input_size, num_classes

    def u(k, shape, bound):
        return jax.random.uniform(k, shape, jnp.float32, -bound, bound)

    kl = 1.0 / np.sqrt(H)
    p = {
        # LSTM layer 0 (PyTorch stores (4H, in); transposed in the wrapper)
        "w_ih0": u(ks[0], (4 * H, D), kl),
        "w_hh0": u(ks[1], (4 * H, H), kl),
        "b_ih0": u(ks[2], (4 * H,), kl),
        "b_hh0": u(ks[3], (4 * H,), kl),
        # LSTM layer 1
        "w_ih1": u(ks[4], (4 * H, H), kl),
        "w_hh1": u(ks[5], (4 * H, H), kl),
        "b_ih1": u(ks[6], (4 * H,), kl),
        "b_hh1": u(ks[7], (4 * H,), kl),
        # residual Linear(D -> H)
        "w_res": u(ks[8], (H, D), 1.0 / np.sqrt(D)),
        "b_res": u(ks[9], (H,), 1.0 / np.sqrt(D)),
        # LayerNorm
        "gamma": jnp.ones((H,), jnp.float32),
        "beta": jnp.zeros((H,), jnp.float32),
        # fc Linear(H -> C)
        "w_fc": u(ks[10], (C, H), kl),
        "b_fc": u(ks[11], (C,), kl),
    }
    return p


def aki_lstm_forward(x_btd, params):
    """x_btd: (B, T, D) batch-first, like the PyTorch module."""
    B, T, D = x_btd.shape
    H = params["w_hh0"].shape[1]
    C = params["w_fc"].shape[0]
    BPAD = max(8, ((B + 7) // 8) * 8)   # full sublane group
    CPAD = 128                          # lane-dense output width

    # Pad batch to a full sublane group (per-t slices in the kernel become
    # tile-aligned; padded rows produce garbage but never touch real rows).
    x_pad = jnp.zeros((BPAD, T, D), jnp.float32).at[:B].set(x_btd)

    # time-major, flattened to (T*BPAD, D): layer-0 input projection is one
    # batched matmul hoisted out of the recurrence.
    x_flat = jnp.transpose(x_pad, (1, 0, 2)).reshape(T * BPAD, D)
    x_mean = jnp.mean(x_pad, axis=1)                      # (BPAD, D) residual input

    wih0 = params["w_ih0"].T                              # (D, 4H)
    b0 = (params["b_ih0"] + params["b_hh0"]).reshape(1, 4 * H)
    whh0 = params["w_hh0"].T                              # (H, 4H)
    wih1 = params["w_ih1"].T                              # (H, 4H)
    whh1 = params["w_hh1"].T                              # (H, 4H)
    b1 = (params["b_ih1"] + params["b_hh1"]).reshape(1, 4 * H)
    wres = params["w_res"].T                              # (D, H)
    bres = params["b_res"].reshape(1, H)

    # lane-dense padded classifier head
    wfc_pad = jnp.zeros((H, CPAD), jnp.float32).at[:, :C].set(params["w_fc"].T)
    bfc_pad = jnp.zeros((1, CPAD), jnp.float32).at[:, :C].set(
        params["b_fc"].reshape(1, C))

    args = (
        x_flat, x_mean, wih0, b0, whh0, wih1, whh1, b1, wres, bres,
        params["gamma"].reshape(1, H), params["beta"].reshape(1, H),
        wfc_pad, bfc_pad,
    )

    vmem = pl.BlockSpec(memory_space=pltpu.MemorySpace.VMEM)
    out_pad = pl.pallas_call(
        aki_lstm_kernel,
        out_shape=jax.ShapeDtypeStruct((BPAD, CPAD), jnp.float32),
        in_specs=[vmem] * len(args),
        out_specs=vmem,
    )(*args)
    return out_pad[:B, :C]


def aki_lstm_reference(x_btd, params):
    """Pure-JAX reference of the eval-mode forward pass (for validation)."""
    B, T, D = x_btd.shape
    H = params["w_hh0"].shape[1]

    def cell(x_t, h, c, wih, whh, bih, bhh):
        z = x_t @ wih.T + bih + h @ whh.T + bhh
        i, f, g, o = jnp.split(z, 4, axis=-1)
        c = jax.nn.sigmoid(f) * c + jax.nn.sigmoid(i) * jnp.tanh(g)
        h = jax.nn.sigmoid(o) * jnp.tanh(c)
        return h, c

    h0 = c0 = h1 = c1 = jnp.zeros((B, H), jnp.float32)
    for t in range(T):
        h0, c0 = cell(x_btd[:, t], h0, c0, params["w_ih0"], params["w_hh0"],
                      params["b_ih0"], params["b_hh0"])
        h1, c1 = cell(h0, h1, c1, params["w_ih1"], params["w_hh1"],
                      params["b_ih1"], params["b_hh1"])
    h = h1 + (x_btd.mean(axis=1) @ params["w_res"].T + params["b_res"])
    mu = h.mean(-1, keepdims=True)
    var = ((h - mu) ** 2).mean(-1, keepdims=True)
    h = (h - mu) / jnp.sqrt(var + 1e-5) * params["gamma"] + params["beta"]
    h = h * jax.nn.sigmoid(h)
    return h @ params["w_fc"].T + params["b_fc"]


if __name__ == "__main__":
    B, T, D = 2, 8, 16       # batch, seq_len, input_size
    H, C = 32, 2             # hidden_size, num_classes

    key = jax.random.PRNGKey(0)
    kx, kp = jax.random.split(key)
    x = jax.random.normal(kx, (B, T, D), jnp.float32)
    params = make_params(kp, D, H, C)

    logits = aki_lstm_forward(x, params)
    logits = jax.block_until_ready(logits)

    ref = aki_lstm_reference(x, params)
    np.testing.assert_allclose(np.asarray(logits), np.asarray(ref),
                               rtol=1e-4, atol=1e-4)
    print("KERNEL_OK")
</pallas_src>

<mosaic_0001>
module attributes {stable_mosaic.version = 11 : i64} {
  func.func @aki_lstm_kernel(%arg0: memref<64x16xf32, #tpu.memory_space<vmem>>, %arg1: memref<8x16xf32, #tpu.memory_space<vmem>>, %arg2: memref<16x128xf32, #tpu.memory_space<vmem>>, %arg3: memref<1x128xf32, #tpu.memory_space<vmem>>, %arg4: memref<32x128xf32, #tpu.memory_space<vmem>>, %arg5: memref<32x128xf32, #tpu.memory_space<vmem>>, %arg6: memref<32x128xf32, #tpu.memory_space<vmem>>, %arg7: memref<1x128xf32, #tpu.memory_space<vmem>>, %arg8: memref<16x32xf32, #tpu.memory_space<vmem>>, %arg9: memref<1x32xf32, #tpu.memory_space<vmem>>, %arg10: memref<1x32xf32, #tpu.memory_space<vmem>>, %arg11: memref<1x32xf32, #tpu.memory_space<vmem>>, %arg12: memref<32x128xf32, #tpu.memory_space<vmem>>, %arg13: memref<1x128xf32, #tpu.memory_space<vmem>>, %arg14: memref<8x128xf32, #tpu.memory_space<vmem>>) attributes {dimension_semantics = [], scalar_prefetch = 0 : i64, scratch_operands = 0 : i64, tpu.core_type = #tpu.core_type<tc>} {
    %c0 = arith.constant 0 : index
    %c0_0 = arith.constant 0 : index
    %0 = vector.load %arg0[%c0, %c0_0] : memref<64x16xf32, #tpu.memory_space<vmem>>, vector<64x16xf32>
    %c0_1 = arith.constant 0 : index
    %c0_2 = arith.constant 0 : index
    %1 = vector.load %arg2[%c0_1, %c0_2] : memref<16x128xf32, #tpu.memory_space<vmem>>, vector<16x128xf32>
    %cst = arith.constant dense<0.000000e+00> : vector<64x128xf32>
    %2 = tpu.matmul %0, %1, %cst {dimension_numbers = #tpu.dot_dimension_numbers<[1], [0], [0], [1], [0, 0, 1, 1], [], []>} : vector<64x16xf32>, vector<16x128xf32>, vector<64x128xf32> -> vector<64x128xf32>
    %c0_3 = arith.constant 0 : index
    %c0_4 = arith.constant 0 : index
    %3 = vector.load %arg3[%c0_3, %c0_4] : memref<1x128xf32, #tpu.memory_space<vmem>>, vector<1x128xf32>
    %4 = vector.broadcast %3 : vector<1x128xf32> to vector<64x128xf32>
    %5 = arith.addf %2, %4 : vector<64x128xf32>
    %c0_5 = arith.constant 0 : index
    %c0_6 = arith.constant 0 : index
    %6 = vector.load %arg1[%c0_5, %c0_6] : memref<8x16xf32, #tpu.memory_space<vmem>>, vector<8x16xf32>
    %c0_7 = arith.constant 0 : index
    %c0_8 = arith.constant 0 : index
    %7 = vector.load %arg8[%c0_7, %c0_8] : memref<16x32xf32, #tpu.memory_space<vmem>>, vector<16x32xf32>
    %cst_9 = arith.constant dense<0.000000e+00> : vector<8x32xf32>
    %8 = tpu.matmul %6, %7, %cst_9 {dimension_numbers = #tpu.dot_dimension_numbers<[1], [0], [0], [1], [0, 0, 1, 1], [], []>} : vector<8x16xf32>, vector<16x32xf32>, vector<8x32xf32> -> vector<8x32xf32>
    %c0_10 = arith.constant 0 : index
    %c0_11 = arith.constant 0 : index
    %9 = vector.load %arg9[%c0_10, %c0_11] : memref<1x32xf32, #tpu.memory_space<vmem>>, vector<1x32xf32>
    %10 = vector.broadcast %9 : vector<1x32xf32> to vector<8x32xf32>
    %11 = arith.addf %8, %10 : vector<8x32xf32>
    %c0_12 = arith.constant 0 : index
    %c0_13 = arith.constant 0 : index
    %12 = vector.load %arg4[%c0_12, %c0_13] : memref<32x128xf32, #tpu.memory_space<vmem>>, vector<32x128xf32>
    %c0_14 = arith.constant 0 : index
    %c0_15 = arith.constant 0 : index
    %13 = vector.load %arg6[%c0_14, %c0_15] : memref<32x128xf32, #tpu.memory_space<vmem>>, vector<32x128xf32>
    %c0_16 = arith.constant 0 : index
    %c0_17 = arith.constant 0 : index
    %14 = vector.load %arg5[%c0_16, %c0_17] : memref<32x128xf32, #tpu.memory_space<vmem>>, vector<32x128xf32>
    %c0_18 = arith.constant 0 : index
    %c0_19 = arith.constant 0 : index
    %15 = vector.load %arg7[%c0_18, %c0_19] : memref<1x128xf32, #tpu.memory_space<vmem>>, vector<1x128xf32>
    %16 = vector.shape_cast %15 : vector<1x128xf32> to vector<1x128xf32>
    %17 = vector.broadcast %16 : vector<1x128xf32> to vector<8x128xf32>
    %cst_20 = arith.constant 0.000000e+00 : f32
    %18 = vector.broadcast %cst_20 : f32 to vector<8x32xf32>
    %cst_21 = arith.constant 0.000000e+00 : f32
    %19 = vector.broadcast %cst_21 : f32 to vector<8x128xf32>
    %cst_22 = arith.constant 0.000000e+00 : f32
    %20 = vector.broadcast %cst_22 : f32 to vector<8x128xf32>
    %21 = vector.extract_strided_slice %5 {offsets = [0, 0], sizes = [8, 128], strides = [1, 1]} : vector<64x128xf32> to vector<8x128xf32>
    %22 = arith.addf %21, %19 : vector<8x128xf32>
    %cst_23 = arith.constant 5.000000e-01 : f32
    %23 = vector.broadcast %cst_23 : f32 to vector<8x128xf32>
    %24 = arith.mulf %23, %22 : vector<8x128xf32>
    %25 = math.tanh %24 : vector<8x128xf32>
    %cst_24 = arith.constant 1.000000e+00 : f32
    %26 = vector.broadcast %cst_24 : f32 to vector<8x128xf32>
    %27 = arith.addf %25, %26 : vector<8x128xf32>
    %cst_25 = arith.constant 5.000000e-01 : f32
    %28 = vector.broadcast %cst_25 : f32 to vector<8x128xf32>
    %29 = arith.mulf %28, %27 : vector<8x128xf32>
    %30 = math.tanh %22 : vector<8x128xf32>
    %31 = vector.extract_strided_slice %29 {offsets = [0, 0], sizes = [8, 32], strides = [1, 1]} : vector<8x128xf32> to vector<8x32xf32>
    %32 = vector.extract_strided_slice %29 {offsets = [0, 32], sizes = [8, 32], strides = [1, 1]} : vector<8x128xf32> to vector<8x32xf32>
    %33 = vector.extract_strided_slice %30 {offsets = [0, 64], sizes = [8, 32], strides = [1, 1]} : vector<8x128xf32> to vector<8x32xf32>
    %34 = vector.extract_strided_slice %29 {offsets = [0, 96], sizes = [8, 32], strides = [1, 1]} : vector<8x128xf32> to vector<8x32xf32>
    %35 = arith.mulf %32, %18 : vector<8x32xf32>
    %36 = arith.mulf %31, %33 : vector<8x32xf32>
    %37 = arith.addf %35, %36 : vector<8x32xf32>
    %38 = math.tanh %37 : vector<8x32xf32>
    %39 = arith.mulf %34, %38 : vector<8x32xf32>
    %cst_26 = arith.constant dense<0.000000e+00> : vector<8x128xf32>
    %40 = tpu.matmul %39, %12, %cst_26 {dimension_numbers = #tpu.dot_dimension_numbers<[1], [0], [0], [1], [0, 0, 1, 1], [], []>} : vector<8x32xf32>, vector<32x128xf32>, vector<8x128xf32> -> vector<8x128xf32>
    %41 = arith.addf %20, %17 : vector<8x128xf32>
    %cst_27 = arith.constant dense<0.000000e+00> : vector<8x128xf32>
    %42 = tpu.matmul %39, %14, %cst_27 {dimension_numbers = #tpu.dot_dimension_numbers<[1], [0], [0], [1], [0, 0, 1, 1], [], []>} : vector<8x32xf32>, vector<32x128xf32>, vector<8x128xf32> -> vector<8x128xf32>
    %43 = arith.addf %41, %42 : vector<8x128xf32>
    %cst_28 = arith.constant 5.000000e-01 : f32
    %44 = vector.broadcast %cst_28 : f32 to vector<8x128xf32>
    %45 = arith.mulf %44, %43 : vector<8x128xf32>
    %46 = math.tanh %45 : vector<8x128xf32>
    %cst_29 = arith.constant 1.000000e+00 : f32
    %47 = vector.broadcast %cst_29 : f32 to vector<8x128xf32>
    %48 = arith.addf %46, %47 : vector<8x128xf32>
    %cst_30 = arith.constant 5.000000e-01 : f32
    %49 = vector.broadcast %cst_30 : f32 to vector<8x128xf32>
    %50 = arith.mulf %49, %48 : vector<8x128xf32>
    %51 = math.tanh %43 : vector<8x128xf32>
    %52 = vector.extract_strided_slice %50 {offsets = [0, 0], sizes = [8, 32], strides = [1, 1]} : vector<8x128xf32> to vector<8x32xf32>
    %53 = vector.extract_strided_slice %50 {offsets = [0, 32], sizes = [8, 32], strides = [1, 1]} : vector<8x128xf32> to vector<8x32xf32>
    %54 = vector.extract_strided_slice %51 {offsets = [0, 64], sizes = [8, 32], strides = [1, 1]} : vector<8x128xf32> to vector<8x32xf32>
    %55 = vector.extract_strided_slice %50 {offsets = [0, 96], sizes = [8, 32], strides = [1, 1]} : vector<8x128xf32> to vector<8x32xf32>
    %56 = arith.mulf %53, %18 : vector<8x32xf32>
    %57 = arith.mulf %52, %54 : vector<8x32xf32>
    %58 = arith.addf %56, %57 : vector<8x32xf32>
    %59 = math.tanh %58 : vector<8x32xf32>
    %60 = arith.mulf %55, %59 : vector<8x32xf32>
    %cst_31 = arith.constant dense<0.000000e+00> : vector<8x128xf32>
    %61 = tpu.matmul %60, %13, %cst_31 {dimension_numbers = #tpu.dot_dimension_numbers<[1], [0], [0], [1], [0, 0, 1, 1], [], []>} : vector<8x32xf32>, vector<32x128xf32>, vector<8x128xf32> -> vector<8x128xf32>
    %62 = vector.extract_strided_slice %5 {offsets = [8, 0], sizes = [8, 128], strides = [1, 1]} : vector<64x128xf32> to vector<8x128xf32>
    %63 = arith.addf %62, %40 : vector<8x128xf32>
    %cst_32 = arith.constant 5.000000e-01 : f32
    %64 = vector.broadcast %cst_32 : f32 to vector<8x128xf32>
    %65 = arith.mulf %64, %63 : vector<8x128xf32>
    %66 = math.tanh %65 : vector<8x128xf32>
    %cst_33 = arith.constant 1.000000e+00 : f32
    %67 = vector.broadcast %cst_33 : f32 to vector<8x128xf32>
    %68 = arith.addf %66, %67 : vector<8x128xf32>
    %cst_34 = arith.constant 5.000000e-01 : f32
    %69 = vector.broadcast %cst_34 : f32 to vector<8x128xf32>
    %70 = arith.mulf %69, %68 : vector<8x128xf32>
    %71 = math.tanh %63 : vector<8x128xf32>
    %72 = vector.extract_strided_slice %70 {offsets = [0, 0], sizes = [8, 32], strides = [1, 1]} : vector<8x128xf32> to vector<8x32xf32>
    %73 = vector.extract_strided_slice %70 {offsets = [0, 32], sizes = [8, 32], strides = [1, 1]} : vector<8x128xf32> to vector<8x32xf32>
    %74 = vector.extract_strided_slice %71 {offsets = [0, 64], sizes = [8, 32], strides = [1, 1]} : vector<8x128xf32> to vector<8x32xf32>
    %75 = vector.extract_strided_slice %70 {offsets = [0, 96], sizes = [8, 32], strides = [1, 1]} : vector<8x128xf32> to vector<8x32xf32>
    %76 = arith.mulf %73, %37 : vector<8x32xf32>
    %77 = arith.mulf %72, %74 : vector<8x32xf32>
    %78 = arith.addf %76, %77 : vector<8x32xf32>
    %79 = math.tanh %78 : vector<8x32xf32>
    %80 = arith.mulf %75, %79 : vector<8x32xf32>
    %cst_35 = arith.constant dense<0.000000e+00> : vector<8x128xf32>
    %81 = tpu.matmul %80, %12, %cst_35 {dimension_numbers = #tpu.dot_dimension_numbers<[1], [0], [0], [1], [0, 0, 1, 1], [], []>} : vector<8x32xf32>, vector<32x128xf32>, vector<8x128xf32> -> vector<8x128xf32>
    %82 = arith.addf %61, %17 : vector<8x128xf32>
    %cst_36 = arith.constant dense<0.000000e+00> : vector<8x128xf32>
    %83 = tpu.matmul %80, %14, %cst_36 {dimension_numbers = #tpu.dot_dimension_numbers<[1], [0], [0], [1], [0, 0, 1, 1], [], []>} : vector<8x32xf32>, vector<32x128xf32>, vector<8x128xf32> -> vector<8x128xf32>
    %84 = arith.addf %82, %83 : vector<8x128xf32>
    %cst_37 = arith.constant 5.000000e-01 : f32
    %85 = vector.broadcast %cst_37 : f32 to vector<8x128xf32>
    %86 = arith.mulf %85, %84 : vector<8x128xf32>
    %87 = math.tanh %86 : vector<8x128xf32>
    %cst_38 = arith.constant 1.000000e+00 : f32
    %88 = vector.broadcast %cst_38 : f32 to vector<8x128xf32>
    %89 = arith.addf %87, %88 : vector<8x128xf32>
    %cst_39 = arith.constant 5.000000e-01 : f32
    %90 = vector.broadcast %cst_39 : f32 to vector<8x128xf32>
    %91 = arith.mulf %90, %89 : vector<8x128xf32>
    %92 = math.tanh %84 : vector<8x128xf32>
    %93 = vector.extract_strided_slice %91 {offsets = [0, 0], sizes = [8, 32], strides = [1, 1]} : vector<8x128xf32> to vector<8x32xf32>
    %94 = vector.extract_strided_slice %91 {offsets = [0, 32], sizes = [8, 32], strides = [1, 1]} : vector<8x128xf32> to vector<8x32xf32>
    %95 = vector.extract_strided_slice %92 {offsets = [0, 64], sizes = [8, 32], strides = [1, 1]} : vector<8x128xf32> to vector<8x32xf32>
    %96 = vector.extract_strided_slice %91 {offsets = [0, 96], sizes = [8, 32], strides = [1, 1]} : vector<8x128xf32> to vector<8x32xf32>
    %97 = arith.mulf %94, %58 : vector<8x32xf32>
    %98 = arith.mulf %93, %95 : vector<8x32xf32>
    %99 = arith.addf %97, %98 : vector<8x32xf32>
    %100 = math.tanh %99 : vector<8x32xf32>
    %101 = arith.mulf %96, %100 : vector<8x32xf32>
    %cst_40 = arith.constant dense<0.000000e+00> : vector<8x128xf32>
    %102 = tpu.matmul %101, %13, %cst_40 {dimension_numbers = #tpu.dot_dimension_numbers<[1], [0], [0], [1], [0, 0, 1, 1], [], []>} : vector<8x32xf32>, vector<32x128xf32>, vector<8x128xf32> -> vector<8x128xf32>
    %103 = vector.extract_strided_slice %5 {offsets = [16, 0], sizes = [8, 128], strides = [1, 1]} : vector<64x128xf32> to vector<8x128xf32>
    %104 = arith.addf %103, %81 : vector<8x128xf32>
    %cst_41 = arith.constant 5.000000e-01 : f32
    %105 = vector.broadcast %cst_41 : f32 to vector<8x128xf32>
    %106 = arith.mulf %105, %104 : vector<8x128xf32>
    %107 = math.tanh %106 : vector<8x128xf32>
    %cst_42 = arith.constant 1.000000e+00 : f32
    %108 = vector.broadcast %cst_42 : f32 to vector<8x128xf32>
    %109 = arith.addf %107, %108 : vector<8x128xf32>
    %cst_43 = arith.constant 5.000000e-01 : f32
    %110 = vector.broadcast %cst_43 : f32 to vector<8x128xf32>
    %111 = arith.mulf %110, %109 : vector<8x128xf32>
    %112 = math.tanh %104 : vector<8x128xf32>
    %113 = vector.extract_strided_slice %111 {offsets = [0, 0], sizes = [8, 32], strides = [1, 1]} : vector<8x128xf32> to vector<8x32xf32>
    %114 = vector.extract_strided_slice %111 {offsets = [0, 32], sizes = [8, 32], strides = [1, 1]} : vector<8x128xf32> to vector<8x32xf32>
    %115 = vector.extract_strided_slice %112 {offsets = [0, 64], sizes = [8, 32], strides = [1, 1]} : vector<8x128xf32> to vector<8x32xf32>
    %116 = vector.extract_strided_slice %111 {offsets = [0, 96], sizes = [8, 32], strides = [1, 1]} : vector<8x128xf32> to vector<8x32xf32>
    %117 = arith.mulf %114, %78 : vector<8x32xf32>
    %118 = arith.mulf %113, %115 : vector<8x32xf32>
    %119 = arith.addf %117, %118 : vector<8x32xf32>
    %120 = math.tanh %119 : vector<8x32xf32>
    %121 = arith.mulf %116, %120 : vector<8x32xf32>
    %cst_44 = arith.constant dense<0.000000e+00> : vector<8x128xf32>
    %122 = tpu.matmul %121, %12, %cst_44 {dimension_numbers = #tpu.dot_dimension_numbers<[1], [0], [0], [1], [0, 0, 1, 1], [], []>} : vector<8x32xf32>, vector<32x128xf32>, vector<8x128xf32> -> vector<8x128xf32>
    %123 = arith.addf %102, %17 : vector<8x128xf32>
    %cst_45 = arith.constant dense<0.000000e+00> : vector<8x128xf32>
    %124 = tpu.matmul %121, %14, %cst_45 {dimension_numbers = #tpu.dot_dimension_numbers<[1], [0], [0], [1], [0, 0, 1, 1], [], []>} : vector<8x32xf32>, vector<32x128xf32>, vector<8x128xf32> -> vector<8x128xf32>
    %125 = arith.addf %123, %124 : vector<8x128xf32>
    %cst_46 = arith.constant 5.000000e-01 : f32
    %126 = vector.broadcast %cst_46 : f32 to vector<8x128xf32>
    %127 = arith.mulf %126, %125 : vector<8x128xf32>
    %128 = math.tanh %127 : vector<8x128xf32>
    %cst_47 = arith.constant 1.000000e+00 : f32
    %129 = vector.broadcast %cst_47 : f32 to vector<8x128xf32>
    %130 = arith.addf %128, %129 : vector<8x128xf32>
    %cst_48 = arith.constant 5.000000e-01 : f32
    %131 = vector.broadcast %cst_48 : f32 to vector<8x128xf32>
    %132 = arith.mulf %131, %130 : vector<8x128xf32>
    %133 = math.tanh %125 : vector<8x128xf32>
    %134 = vector.extract_strided_slice %132 {offsets = [0, 0], sizes = [8, 32], strides = [1, 1]} : vector<8x128xf32> to vector<8x32xf32>
    %135 = vector.extract_strided_slice %132 {offsets = [0, 32], sizes = [8, 32], strides = [1, 1]} : vector<8x128xf32> to vector<8x32xf32>
    %136 = vector.extract_strided_slice %133 {offsets = [0, 64], sizes = [8, 32], strides = [1, 1]} : vector<8x128xf32> to vector<8x32xf32>
    %137 = vector.extract_strided_slice %132 {offsets = [0, 96], sizes = [8, 32], strides = [1, 1]} : vector<8x128xf32> to vector<8x32xf32>
    %138 = arith.mulf %135, %99 : vector<8x32xf32>
    %139 = arith.mulf %134, %136 : vector<8x32xf32>
    %140 = arith.addf %138, %139 : vector<8x32xf32>
    %141 = math.tanh %140 : vector<8x32xf32>
    %142 = arith.mulf %137, %141 : vector<8x32xf32>
    %cst_49 = arith.constant dense<0.000000e+00> : vector<8x128xf32>
    %143 = tpu.matmul %142, %13, %cst_49 {dimension_numbers = #tpu.dot_dimension_numbers<[1], [0], [0], [1], [0, 0, 1, 1], [], []>} : vector<8x32xf32>, vector<32x128xf32>, vector<8x128xf32> -> vector<8x128xf32>
    %144 = vector.extract_strided_slice %5 {offsets = [24, 0], sizes = [8, 128], strides = [1, 1]} : vector<64x128xf32> to vector<8x128xf32>
    %145 = arith.addf %144, %122 : vector<8x128xf32>
    %cst_50 = arith.constant 5.000000e-01 : f32
    %146 = vector.broadcast %cst_50 : f32 to vector<8x128xf32>
    %147 = arith.mulf %146, %145 : vector<8x128xf32>
    %148 = math.tanh %147 : vector<8x128xf32>
    %cst_51 = arith.constant 1.000000e+00 : f32
    %149 = vector.broadcast %cst_51 : f32 to vector<8x128xf32>
    %150 = arith.addf %148, %149 : vector<8x128xf32>
    %cst_52 = arith.constant 5.000000e-01 : f32
    %151 = vector.broadcast %cst_52 : f32 to vector<8x128xf32>
    %152 = arith.mulf %151, %150 : vector<8x128xf32>
    %153 = math.tanh %145 : vector<8x128xf32>
    %154 = vector.extract_strided_slice %152 {offsets = [0, 0], sizes = [8, 32], strides = [1, 1]} : vector<8x128xf32> to vector<8x32xf32>
    %155 = vector.extract_strided_slice %152 {offsets = [0, 32], sizes = [8, 32], strides = [1, 1]} : vector<8x128xf32> to vector<8x32xf32>
    %156 = vector.extract_strided_slice %153 {offsets = [0, 64], sizes = [8, 32], strides = [1, 1]} : vector<8x128xf32> to vector<8x32xf32>
    %157 = vector.extract_strided_slice %152 {offsets = [0, 96], sizes = [8, 32], strides = [1, 1]} : vector<8x128xf32> to vector<8x32xf32>
    %158 = arith.mulf %155, %119 : vector<8x32xf32>
    %159 = arith.mulf %154, %156 : vector<8x32xf32>
    %160 = arith.addf %158, %159 : vector<8x32xf32>
    %161 = math.tanh %160 : vector<8x32xf32>
    %162 = arith.mulf %157, %161 : vector<8x32xf32>
    %cst_53 = arith.constant dense<0.000000e+00> : vector<8x128xf32>
    %163 = tpu.matmul %162, %12, %cst_53 {dimension_numbers = #tpu.dot_dimension_numbers<[1], [0], [0], [1], [0, 0, 1, 1], [], []>} : vector<8x32xf32>, vector<32x128xf32>, vector<8x128xf32> -> vector<8x128xf32>
    %164 = arith.addf %143, %17 : vector<8x128xf32>
    %cst_54 = arith.constant dense<0.000000e+00> : vector<8x128xf32>
    %165 = tpu.matmul %162, %14, %cst_54 {dimension_numbers = #tpu.dot_dimension_numbers<[1], [0], [0], [1], [0, 0, 1, 1], [], []>} : vector<8x32xf32>, vector<32x128xf32>, vector<8x128xf32> -> vector<8x128xf32>
    %166 = arith.addf %164, %165 : vector<8x128xf32>
    %cst_55 = arith.constant 5.000000e-01 : f32
    %167 = vector.broadcast %cst_55 : f32 to vector<8x128xf32>
    %168 = arith.mulf %167, %166 : vector<8x128xf32>
    %169 = math.tanh %168 : vector<8x128xf32>
    %cst_56 = arith.constant 1.000000e+00 : f32
    %170 = vector.broadcast %cst_56 : f32 to vector<8x128xf32>
    %171 = arith.addf %169, %170 : vector<8x128xf32>
    %cst_57 = arith.constant 5.000000e-01 : f32
    %172 = vector.broadcast %cst_57 : f32 to vector<8x128xf32>
    %173 = arith.mulf %172, %171 : vector<8x128xf32>
    %174 = math.tanh %166 : vector<8x128xf32>
    %175 = vector.extract_strided_slice %173 {offsets = [0, 0], sizes = [8, 32], strides = [1, 1]} : vector<8x128xf32> to vector<8x32xf32>
    %176 = vector.extract_strided_slice %173 {offsets = [0, 32], sizes = [8, 32], strides = [1, 1]} : vector<8x128xf32> to vector<8x32xf32>
    %177 = vector.extract_strided_slice %174 {offsets = [0, 64], sizes = [8, 32], strides = [1, 1]} : vector<8x128xf32> to vector<8x32xf32>
    %178 = vector.extract_strided_slice %173 {offsets = [0, 96], sizes = [8, 32], strides = [1, 1]} : vector<8x128xf32> to vector<8x32xf32>
    %179 = arith.mulf %176, %140 : vector<8x32xf32>
    %180 = arith.mulf %175, %177 : vector<8x32xf32>
    %181 = arith.addf %179, %180 : vector<8x32xf32>
    %182 = math.tanh %181 : vector<8x32xf32>
    %183 = arith.mulf %178, %182 : vector<8x32xf32>
    %cst_58 = arith.constant dense<0.000000e+00> : vector<8x128xf32>
    %184 = tpu.matmul %183, %13, %cst_58 {dimension_numbers = #tpu.dot_dimension_numbers<[1], [0], [0], [1], [0, 0, 1, 1], [], []>} : vector<8x32xf32>, vector<32x128xf32>, vector<8x128xf32> -> vector<8x128xf32>
    %185 = vector.extract_strided_slice %5 {offsets = [32, 0], sizes = [8, 128], strides = [1, 1]} : vector<64x128xf32> to vector<8x128xf32>
    %186 = arith.addf %185, %163 : vector<8x128xf32>
    %cst_59 = arith.constant 5.000000e-01 : f32
    %187 = vector.broadcast %cst_59 : f32 to vector<8x128xf32>
    %188 = arith.mulf %187, %186 : vector<8x128xf32>
    %189 = math.tanh %188 : vector<8x128xf32>
    %cst_60 = arith.constant 1.000000e+00 : f32
    %190 = vector.broadcast %cst_60 : f32 to vector<8x128xf32>
    %191 = arith.addf %189, %190 : vector<8x128xf32>
    %cst_61 = arith.constant 5.000000e-01 : f32
    %192 = vector.broadcast %cst_61 : f32 to vector<8x128xf32>
    %193 = arith.mulf %192, %191 : vector<8x128xf32>
    %194 = math.tanh %186 : vector<8x128xf32>
    %195 = vector.extract_strided_slice %193 {offsets = [0, 0], sizes = [8, 32], strides = [1, 1]} : vector<8x128xf32> to vector<8x32xf32>
    %196 = vector.extract_strided_slice %193 {offsets = [0, 32], sizes = [8, 32], strides = [1, 1]} : vector<8x128xf32> to vector<8x32xf32>
    %197 = vector.extract_strided_slice %194 {offsets = [0, 64], sizes = [8, 32], strides = [1, 1]} : vector<8x128xf32> to vector<8x32xf32>
    %198 = vector.extract_strided_slice %193 {offsets = [0, 96], sizes = [8, 32], strides = [1, 1]} : vector<8x128xf32> to vector<8x32xf32>
    %199 = arith.mulf %196, %160 : vector<8x32xf32>
    %200 = arith.mulf %195, %197 : vector<8x32xf32>
    %201 = arith.addf %199, %200 : vector<8x32xf32>
    %202 = math.tanh %201 : vector<8x32xf32>
    %203 = arith.mulf %198, %202 : vector<8x32xf32>
    %cst_62 = arith.constant dense<0.000000e+00> : vector<8x128xf32>
    %204 = tpu.matmul %203, %12, %cst_62 {dimension_numbers = #tpu.dot_dimension_numbers<[1], [0], [0], [1], [0, 0, 1, 1], [], []>} : vector<8x32xf32>, vector<32x128xf32>, vector<8x128xf32> -> vector<8x128xf32>
    %205 = arith.addf %184, %17 : vector<8x128xf32>
    %cst_63 = arith.constant dense<0.000000e+00> : vector<8x128xf32>
    %206 = tpu.matmul %203, %14, %cst_63 {dimension_numbers = #tpu.dot_dimension_numbers<[1], [0], [0], [1], [0, 0, 1, 1], [], []>} : vector<8x32xf32>, vector<32x128xf32>, vector<8x128xf32> -> vector<8x128xf32>
    %207 = arith.addf %205, %206 : vector<8x128xf32>
    %cst_64 = arith.constant 5.000000e-01 : f32
    %208 = vector.broadcast %cst_64 : f32 to vector<8x128xf32>
    %209 = arith.mulf %208, %207 : vector<8x128xf32>
    %210 = math.tanh %209 : vector<8x128xf32>
    %cst_65 = arith.constant 1.000000e+00 : f32
    %211 = vector.broadcast %cst_65 : f32 to vector<8x128xf32>
    %212 = arith.addf %210, %211 : vector<8x128xf32>
    %cst_66 = arith.constant 5.000000e-01 : f32
    %213 = vector.broadcast %cst_66 : f32 to vector<8x128xf32>
    %214 = arith.mulf %213, %212 : vector<8x128xf32>
    %215 = math.tanh %207 : vector<8x128xf32>
    %216 = vector.extract_strided_slice %214 {offsets = [0, 0], sizes = [8, 32], strides = [1, 1]} : vector<8x128xf32> to vector<8x32xf32>
    %217 = vector.extract_strided_slice %214 {offsets = [0, 32], sizes = [8, 32], strides = [1, 1]} : vector<8x128xf32> to vector<8x32xf32>
    %218 = vector.extract_strided_slice %215 {offsets = [0, 64], sizes = [8, 32], strides = [1, 1]} : vector<8x128xf32> to vector<8x32xf32>
    %219 = vector.extract_strided_slice %214 {offsets = [0, 96], sizes = [8, 32], strides = [1, 1]} : vector<8x128xf32> to vector<8x32xf32>
    %220 = arith.mulf %217, %181 : vector<8x32xf32>
    %221 = arith.mulf %216, %218 : vector<8x32xf32>
    %222 = arith.addf %220, %221 : vector<8x32xf32>
    %223 = math.tanh %222 : vector<8x32xf32>
    %224 = arith.mulf %219, %223 : vector<8x32xf32>
    %cst_67 = arith.constant dense<0.000000e+00> : vector<8x128xf32>
    %225 = tpu.matmul %224, %13, %cst_67 {dimension_numbers = #tpu.dot_dimension_numbers<[1], [0], [0], [1], [0, 0, 1, 1], [], []>} : vector<8x32xf32>, vector<32x128xf32>, vector<8x128xf32> -> vector<8x128xf32>
    %226 = vector.extract_strided_slice %5 {offsets = [40, 0], sizes = [8, 128], strides = [1, 1]} : vector<64x128xf32> to vector<8x128xf32>
    %227 = arith.addf %226, %204 : vector<8x128xf32>
    %cst_68 = arith.constant 5.000000e-01 : f32
    %228 = vector.broadcast %cst_68 : f32 to vector<8x128xf32>
    %229 = arith.mulf %228, %227 : vector<8x128xf32>
    %230 = math.tanh %229 : vector<8x128xf32>
    %cst_69 = arith.constant 1.000000e+00 : f32
    %231 = vector.broadcast %cst_69 : f32 to vector<8x128xf32>
    %232 = arith.addf %230, %231 : vector<8x128xf32>
    %cst_70 = arith.constant 5.000000e-01 : f32
    %233 = vector.broadcast %cst_70 : f32 to vector<8x128xf32>
    %234 = arith.mulf %233, %232 : vector<8x128xf32>
    %235 = math.tanh %227 : vector<8x128xf32>
    %236 = vector.extract_strided_slice %234 {offsets = [0, 0], sizes = [8, 32], strides = [1, 1]} : vector<8x128xf32> to vector<8x32xf32>
    %237 = vector.extract_strided_slice %234 {offsets = [0, 32], sizes = [8, 32], strides = [1, 1]} : vector<8x128xf32> to vector<8x32xf32>
    %238 = vector.extract_strided_slice %235 {offsets = [0, 64], sizes = [8, 32], strides = [1, 1]} : vector<8x128xf32> to vector<8x32xf32>
    %239 = vector.extract_strided_slice %234 {offsets = [0, 96], sizes = [8, 32], strides = [1, 1]} : vector<8x128xf32> to vector<8x32xf32>
    %240 = arith.mulf %237, %201 : vector<8x32xf32>
    %241 = arith.mulf %236, %238 : vector<8x32xf32>
    %242 = arith.addf %240, %241 : vector<8x32xf32>
    %243 = math.tanh %242 : vector<8x32xf32>
    %244 = arith.mulf %239, %243 : vector<8x32xf32>
    %cst_71 = arith.constant dense<0.000000e+00> : vector<8x128xf32>
    %245 = tpu.matmul %244, %12, %cst_71 {dimension_numbers = #tpu.dot_dimension_numbers<[1], [0], [0], [1], [0, 0, 1, 1], [], []>} : vector<8x32xf32>, vector<32x128xf32>, vector<8x128xf32> -> vector<8x128xf32>
    %246 = arith.addf %225, %17 : vector<8x128xf32>
    %cst_72 = arith.constant dense<0.000000e+00> : vector<8x128xf32>
    %247 = tpu.matmul %244, %14, %cst_72 {dimension_numbers = #tpu.dot_dimension_numbers<[1], [0], [0], [1], [0, 0, 1, 1], [], []>} : vector<8x32xf32>, vector<32x128xf32>, vector<8x128xf32> -> vector<8x128xf32>
    %248 = arith.addf %246, %247 : vector<8x128xf32>
    %cst_73 = arith.constant 5.000000e-01 : f32
    %249 = vector.broadcast %cst_73 : f32 to vector<8x128xf32>
    %250 = arith.mulf %249, %248 : vector<8x128xf32>
    %251 = math.tanh %250 : vector<8x128xf32>
    %cst_74 = arith.constant 1.000000e+00 : f32
    %252 = vector.broadcast %cst_74 : f32 to vector<8x128xf32>
    %253 = arith.addf %251, %252 : vector<8x128xf32>
    %cst_75 = arith.constant 5.000000e-01 : f32
    %254 = vector.broadcast %cst_75 : f32 to vector<8x128xf32>
    %255 = arith.mulf %254, %253 : vector<8x128xf32>
    %256 = math.tanh %248 : vector<8x128xf32>
    %257 = vector.extract_strided_slice %255 {offsets = [0, 0], sizes = [8, 32], strides = [1, 1]} : vector<8x128xf32> to vector<8x32xf32>
    %258 = vector.extract_strided_slice %255 {offsets = [0, 32], sizes = [8, 32], strides = [1, 1]} : vector<8x128xf32> to vector<8x32xf32>
    %259 = vector.extract_strided_slice %256 {offsets = [0, 64], sizes = [8, 32], strides = [1, 1]} : vector<8x128xf32> to vector<8x32xf32>
    %260 = vector.extract_strided_slice %255 {offsets = [0, 96], sizes = [8, 32], strides = [1, 1]} : vector<8x128xf32> to vector<8x32xf32>
    %261 = arith.mulf %258, %222 : vector<8x32xf32>
    %262 = arith.mulf %257, %259 : vector<8x32xf32>
    %263 = arith.addf %261, %262 : vector<8x32xf32>
    %264 = math.tanh %263 : vector<8x32xf32>
    %265 = arith.mulf %260, %264 : vector<8x32xf32>
    %cst_76 = arith.constant dense<0.000000e+00> : vector<8x128xf32>
    %266 = tpu.matmul %265, %13, %cst_76 {dimension_numbers = #tpu.dot_dimension_numbers<[1], [0], [0], [1], [0, 0, 1, 1], [], []>} : vector<8x32xf32>, vector<32x128xf32>, vector<8x128xf32> -> vector<8x128xf32>
    %267 = vector.extract_strided_slice %5 {offsets = [48, 0], sizes = [8, 128], strides = [1, 1]} : vector<64x128xf32> to vector<8x128xf32>
    %268 = arith.addf %267, %245 : vector<8x128xf32>
    %cst_77 = arith.constant 5.000000e-01 : f32
    %269 = vector.broadcast %cst_77 : f32 to vector<8x128xf32>
    %270 = arith.mulf %269, %268 : vector<8x128xf32>
    %271 = math.tanh %270 : vector<8x128xf32>
    %cst_78 = arith.constant 1.000000e+00 : f32
    %272 = vector.broadcast %cst_78 : f32 to vector<8x128xf32>
    %273 = arith.addf %271, %272 : vector<8x128xf32>
    %cst_79 = arith.constant 5.000000e-01 : f32
    %274 = vector.broadcast %cst_79 : f32 to vector<8x128xf32>
    %275 = arith.mulf %274, %273 : vector<8x128xf32>
    %276 = math.tanh %268 : vector<8x128xf32>
    %277 = vector.extract_strided_slice %275 {offsets = [0, 0], sizes = [8, 32], strides = [1, 1]} : vector<8x128xf32> to vector<8x32xf32>
    %278 = vector.extract_strided_slice %275 {offsets = [0, 32], sizes = [8, 32], strides = [1, 1]} : vector<8x128xf32> to vector<8x32xf32>
    %279 = vector.extract_strided_slice %276 {offsets = [0, 64], sizes = [8, 32], strides = [1, 1]} : vector<8x128xf32> to vector<8x32xf32>
    %280 = vector.extract_strided_slice %275 {offsets = [0, 96], sizes = [8, 32], strides = [1, 1]} : vector<8x128xf32> to vector<8x32xf32>
    %281 = arith.mulf %278, %242 : vector<8x32xf32>
    %282 = arith.mulf %277, %279 : vector<8x32xf32>
    %283 = arith.addf %281, %282 : vector<8x32xf32>
    %284 = math.tanh %283 : vector<8x32xf32>
    %285 = arith.mulf %280, %284 : vector<8x32xf32>
    %cst_80 = arith.constant dense<0.000000e+00> : vector<8x128xf32>
    %286 = tpu.matmul %285, %12, %cst_80 {dimension_numbers = #tpu.dot_dimension_numbers<[1], [0], [0], [1], [0, 0, 1, 1], [], []>} : vector<8x32xf32>, vector<32x128xf32>, vector<8x128xf32> -> vector<8x128xf32>
    %287 = arith.addf %266, %17 : vector<8x128xf32>
    %cst_81 = arith.constant dense<0.000000e+00> : vector<8x128xf32>
    %288 = tpu.matmul %285, %14, %cst_81 {dimension_numbers = #tpu.dot_dimension_numbers<[1], [0], [0], [1], [0, 0, 1, 1], [], []>} : vector<8x32xf32>, vector<32x128xf32>, vector<8x128xf32> -> vector<8x128xf32>
    %289 = arith.addf %287, %288 : vector<8x128xf32>
    %cst_82 = arith.constant 5.000000e-01 : f32
    %290 = vector.broadcast %cst_82 : f32 to vector<8x128xf32>
    %291 = arith.mulf %290, %289 : vector<8x128xf32>
    %292 = math.tanh %291 : vector<8x128xf32>
    %cst_83 = arith.constant 1.000000e+00 : f32
    %293 = vector.broadcast %cst_83 : f32 to vector<8x128xf32>
    %294 = arith.addf %292, %293 : vector<8x128xf32>
    %cst_84 = arith.constant 5.000000e-01 : f32
    %295 = vector.broadcast %cst_84 : f32 to vector<8x128xf32>
    %296 = arith.mulf %295, %294 : vector<8x128xf32>
    %297 = math.tanh %289 : vector<8x128xf32>
    %298 = vector.extract_strided_slice %296 {offsets = [0, 0], sizes = [8, 32], strides = [1, 1]} : vector<8x128xf32> to vector<8x32xf32>
    %299 = vector.extract_strided_slice %296 {offsets = [0, 32], sizes = [8, 32], strides = [1, 1]} : vector<8x128xf32> to vector<8x32xf32>
    %300 = vector.extract_strided_slice %297 {offsets = [0, 64], sizes = [8, 32], strides = [1, 1]} : vector<8x128xf32> to vector<8x32xf32>
    %301 = vector.extract_strided_slice %296 {offsets = [0, 96], sizes = [8, 32], strides = [1, 1]} : vector<8x128xf32> to vector<8x32xf32>
    %302 = arith.mulf %299, %263 : vector<8x32xf32>
    %303 = arith.mulf %298, %300 : vector<8x32xf32>
    %304 = arith.addf %302, %303 : vector<8x32xf32>
    %305 = math.tanh %304 : vector<8x32xf32>
    %306 = arith.mulf %301, %305 : vector<8x32xf32>
    %cst_85 = arith.constant dense<0.000000e+00> : vector<8x128xf32>
    %307 = tpu.matmul %306, %13, %cst_85 {dimension_numbers = #tpu.dot_dimension_numbers<[1], [0], [0], [1], [0, 0, 1, 1], [], []>} : vector<8x32xf32>, vector<32x128xf32>, vector<8x128xf32> -> vector<8x128xf32>
    %308 = vector.extract_strided_slice %5 {offsets = [56, 0], sizes = [8, 128], strides = [1, 1]} : vector<64x128xf32> to vector<8x128xf32>
    %309 = arith.addf %308, %286 : vector<8x128xf32>
    %cst_86 = arith.constant 5.000000e-01 : f32
    %310 = vector.broadcast %cst_86 : f32 to vector<8x128xf32>
    %311 = arith.mulf %310, %309 : vector<8x128xf32>
    %312 = math.tanh %311 : vector<8x128xf32>
    %cst_87 = arith.constant 1.000000e+00 : f32
    %313 = vector.broadcast %cst_87 : f32 to vector<8x128xf32>
    %314 = arith.addf %312, %313 : vector<8x128xf32>
    %cst_88 = arith.constant 5.000000e-01 : f32
    %315 = vector.broadcast %cst_88 : f32 to vector<8x128xf32>
    %316 = arith.mulf %315, %314 : vector<8x128xf32>
    %317 = math.tanh %309 : vector<8x128xf32>
    %318 = vector.extract_strided_slice %316 {offsets = [0, 0], sizes = [8, 32], strides = [1, 1]} : vector<8x128xf32> to vector<8x32xf32>
    %319 = vector.extract_strided_slice %316 {offsets = [0, 32], sizes = [8, 32], strides = [1, 1]} : vector<8x128xf32> to vector<8x32xf32>
    %320 = vector.extract_strided_slice %317 {offsets = [0, 64], sizes = [8, 32], strides = [1, 1]} : vector<8x128xf32> to vector<8x32xf32>
    %321 = vector.extract_strided_slice %316 {offsets = [0, 96], sizes = [8, 32], strides = [1, 1]} : vector<8x128xf32> to vector<8x32xf32>
    %322 = arith.mulf %319, %283 : vector<8x32xf32>
    %323 = arith.mulf %318, %320 : vector<8x32xf32>
    %324 = arith.addf %322, %323 : vector<8x32xf32>
    %325 = math.tanh %324 : vector<8x32xf32>
    %326 = arith.mulf %321, %325 : vector<8x32xf32>
    %327 = arith.addf %307, %17 : vector<8x128xf32>
    %cst_89 = arith.constant dense<0.000000e+00> : vector<8x128xf32>
    %328 = tpu.matmul %326, %14, %cst_89 {dimension_numbers = #tpu.dot_dimension_numbers<[1], [0], [0], [1], [0, 0, 1, 1], [], []>} : vector<8x32xf32>, vector<32x128xf32>, vector<8x128xf32> -> vector<8x128xf32>
    %329 = arith.addf %327, %328 : vector<8x128xf32>
    %cst_90 = arith.constant 5.000000e-01 : f32
    %330 = vector.broadcast %cst_90 : f32 to vector<8x128xf32>
    %331 = arith.mulf %330, %329 : vector<8x128xf32>
    %332 = math.tanh %331 : vector<8x128xf32>
    %cst_91 = arith.constant 1.000000e+00 : f32
    %333 = vector.broadcast %cst_91 : f32 to vector<8x128xf32>
    %334 = arith.addf %332, %333 : vector<8x128xf32>
    %cst_92 = arith.constant 5.000000e-01 : f32
    %335 = vector.broadcast %cst_92 : f32 to vector<8x128xf32>
    %336 = arith.mulf %335, %334 : vector<8x128xf32>
    %337 = math.tanh %329 : vector<8x128xf32>
    %338 = vector.extract_strided_slice %336 {offsets = [0, 0], sizes = [8, 32], strides = [1, 1]} : vector<8x128xf32> to vector<8x32xf32>
    %339 = vector.extract_strided_slice %336 {offsets = [0, 32], sizes = [8, 32], strides = [1, 1]} : vector<8x128xf32> to vector<8x32xf32>
    %340 = vector.extract_strided_slice %337 {offsets = [0, 64], sizes = [8, 32], strides = [1, 1]} : vector<8x128xf32> to vector<8x32xf32>
    %341 = vector.extract_strided_slice %336 {offsets = [0, 96], sizes = [8, 32], strides = [1, 1]} : vector<8x128xf32> to vector<8x32xf32>
    %342 = arith.mulf %339, %304 : vector<8x32xf32>
    %343 = arith.mulf %338, %340 : vector<8x32xf32>
    %344 = arith.addf %342, %343 : vector<8x32xf32>
    %345 = math.tanh %344 : vector<8x32xf32>
    %346 = arith.mulf %341, %345 : vector<8x32xf32>
    %347 = arith.addf %346, %11 : vector<8x32xf32>
    %cst_93 = arith.constant dense<0.000000e+00> : vector<8xf32>
    %348 = vector.multi_reduction <add>, %347, %cst_93 [1] : vector<8x32xf32> to vector<8xf32>
    %349 = vector.shape_cast %348 : vector<8xf32> to vector<8x1xf32>
    %cst_94 = arith.constant 3.200000e+01 : f32
    %350 = vector.broadcast %cst_94 : f32 to vector<8x1xf32>
    %351 = arith.divf %349, %350 : vector<8x1xf32>
    %352 = vector.broadcast %351 : vector<8x1xf32> to vector<8x32xf32>
    %353 = arith.subf %347, %352 : vector<8x32xf32>
    %354 = arith.mulf %353, %353 : vector<8x32xf32>
    %cst_95 = arith.constant dense<0.000000e+00> : vector<8xf32>
    %355 = vector.multi_reduction <add>, %354, %cst_95 [1] : vector<8x32xf32> to vector<8xf32>
    %356 = vector.shape_cast %355 : vector<8xf32> to vector<8x1xf32>
    %cst_96 = arith.constant 3.200000e+01 : f32
    %357 = vector.broadcast %cst_96 : f32 to vector<8x1xf32>
    %358 = arith.divf %356, %357 : vector<8x1xf32>
    %359 = vector.broadcast %351 : vector<8x1xf32> to vector<8x32xf32>
    %360 = arith.subf %347, %359 : vector<8x32xf32>
    %cst_97 = arith.constant 9.99999974E-6 : f32
    %361 = vector.broadcast %cst_97 : f32 to vector<8x1xf32>
    %362 = arith.addf %358, %361 : vector<8x1xf32>
    %363 = math.rsqrt %362 : vector<8x1xf32>
    %364 = vector.broadcast %363 : vector<8x1xf32> to vector<8x32xf32>
    %365 = arith.mulf %360, %364 : vector<8x32xf32>
    %c0_98 = arith.constant 0 : index
    %c0_99 = arith.constant 0 : index
    %366 = vector.load %arg10[%c0_98, %c0_99] : memref<1x32xf32, #tpu.memory_space<vmem>>, vector<1x32xf32>
    %367 = vector.broadcast %366 : vector<1x32xf32> to vector<8x32xf32>
    %368 = arith.mulf %365, %367 : vector<8x32xf32>
    %c0_100 = arith.constant 0 : index
    %c0_101 = arith.constant 0 : index
    %369 = vector.load %arg11[%c0_100, %c0_101] : memref<1x32xf32, #tpu.memory_space<vmem>>, vector<1x32xf32>
    %370 = vector.broadcast %369 : vector<1x32xf32> to vector<8x32xf32>
    %371 = arith.addf %368, %370 : vector<8x32xf32>
    %cst_102 = arith.constant 5.000000e-01 : f32
    %372 = vector.broadcast %cst_102 : f32 to vector<8x32xf32>
    %373 = arith.mulf %372, %371 : vector<8x32xf32>
    %374 = math.tanh %373 : vector<8x32xf32>
    %cst_103 = arith.constant 1.000000e+00 : f32
    %375 = vector.broadcast %cst_103 : f32 to vector<8x32xf32>
    %376 = arith.addf %374, %375 : vector<8x32xf32>
    %cst_104 = arith.constant 5.000000e-01 : f32
    %377 = vector.broadcast %cst_104 : f32 to vector<8x32xf32>
    %378 = arith.mulf %377, %376 : vector<8x32xf32>
    %379 = arith.mulf %371, %378 : vector<8x32xf32>
    %c0_105 = arith.constant 0 : index
    %c0_106 = arith.constant 0 : index
    %380 = vector.load %arg12[%c0_105, %c0_106] : memref<32x128xf32, #tpu.memory_space<vmem>>, vector<32x128xf32>
    %cst_107 = arith.constant dense<0.000000e+00> : vector<8x128xf32>
    %381 = tpu.matmul %379, %380, %cst_107 {dimension_numbers = #tpu.dot_dimension_numbers<[1], [0], [0], [1], [0, 0, 1, 1], [], []>} : vector<8x32xf32>, vector<32x128xf32>, vector<8x128xf32> -> vector<8x128xf32>
    %c0_108 = arith.constant 0 : index
    %c0_109 = arith.constant 0 : index
    %382 = vector.load %arg13[%c0_108, %c0_109] : memref<1x128xf32, #tpu.memory_space<vmem>>, vector<1x128xf32>
    %383 = vector.broadcast %382 : vector<1x128xf32> to vector<8x128xf32>
    %384 = arith.addf %381, %383 : vector<8x128xf32>
    %c0_110 = arith.constant 0 : index
    %c0_111 = arith.constant 0 : index
    %385 = vector.load %arg14[%c0_110, %c0_111] : memref<8x128xf32, #tpu.memory_space<vmem>>, vector<8x128xf32>
    tpu.vector_store %arg14[%c0_110, %c0_111], %384 {strides = array<i32>} : memref<8x128xf32, #tpu.memory_space<vmem>>, vector<8x128xf32>,
    return
  }
}

</mosaic_0001>

<bundles_post_ra>
// kernel: tpu_custom_call.1
= control target key start
LH: loop header
LB: loop body
LE: loop exit
PB: predicated region body
PF: predicated region fallthrough
CT: control target
= control target key end

     0   :  { %19 = vsyncpa [#allocation3], 0  ;;  %s1956_s0 = inlined_call_operand.vmem [shape: f32[64,16], index: 0, kind: input, shape index: {}]   ;;  %s1957_s1 = inlined_call_operand.hbm [shape: f32[8,16], index: 1, kind: input, shape index: {}]   ;;  %s1958_s2 = inlined_call_operand.vmem [shape: f32[16,128], index: 2, kind: input, shape index: {}]   ;;  %s1959_s3 = inlined_call_operand.vmem [shape: f32[1,128], index: 3, kind: input, shape index: {}]   ;;  %s1960_s4 = inlined_call_operand.vmem [shape: f32[32,128], index: 4, kind: input, shape index: {}]   ;;  %s1961_s5 = inlined_call_operand.vmem [shape: f32[32,128], index: 5, kind: input, shape index: {}]   ;;  %s1962_s6 = inlined_call_operand.hbm [shape: f32[32,128], index: 6, kind: input, shape index: {}]   ;;  %s1963_s7 = inlined_call_operand.vmem [shape: f32[1,128], index: 7, kind: input, shape index: {}]   ;;  %s1964_s8 = inlined_call_operand.hbm [shape: f32[16,32], index: 8, kind: input, shape index: {}]   ;;  %s1965_s9 = inlined_call_operand.vmem [shape: f32[1,32], index: 9, kind: input, shape index: {}]   ;;  %s1966_s10 = inlined_call_operand.vmem [shape: f32[1,32], index: 10, kind: input, shape index: {}]   ;;  %s1967_s11 = inlined_call_operand.vmem [shape: f32[1,32], index: 11, kind: input, shape index: {}]   ;;  %s1968_s12 = inlined_call_operand.hbm [shape: f32[32,128], index: 12, kind: input, shape index: {}]   ;;  %s1969_s13 = inlined_call_operand.vmem [shape: f32[1,128], index: 13, kind: input, shape index: {}]   ;;  %s1970_s14 = inlined_call_operand.hbm [shape: f32[8,128], index: 14, kind: output, shape index: {}]  }
   0x1   :  { %20 = vsyncpa [#allocation6], 0 }
   0x2   :  { %21 = vsyncpa [#allocation9], 0  ;;  %s48_s15 = sshll.u32 %s1962_s6, 4  ;;  %s49_s15 = int_to_ptr.hbm [resolvable:$true] %s48_s15 }
   0x3   :  { %22 = vsyncpa [#allocation4], 0  ;;  %s1513_s16 = smov [#allocation5]   ;;  %s30_s20 = sshll.u32 %s1957_s1, 4  ;;  %s31_s20 = int_to_ptr.hbm [resolvable:$true] %s30_s20 }
   0x4   :  { %s50_s17 = sshll.u32 %s1513_s16, 4  ;;  %s1514_s21 = smov 128   ;;  %s51_s17 = int_to_ptr.vmem [resolvable:$true] %s50_s17 }
   0x5   :  { %s1515_s22 = smov 8   ;;  %s1516_s23 = smov [#allocation2]  }
   0x6   :  { %56 = dma.hbm_to_vmem [thread:$0]  %s49_s15, 512, %s51_s17, [#allocation6], %s1514_s21, %s1514_s21, %s1515_s22  }
   0x7   :  { %s32_s24 = sshll.u32 %s1516_s23, 4  ;;  %s63_s27 = sshll.u32 %s1964_s8, 4  ;;  %s33_s24 = int_to_ptr.vmem [resolvable:$true] %s32_s24  ;;  %s64_s27 = int_to_ptr.hbm [resolvable:$true] %s63_s27 }
   0x8   :  { %35 = dma.hbm_to_vmem [thread:$0]  %s31_s20, 128, %s33_s24, [#allocation3]  }
   0x9   :  { %s82_s29 = sshll.u32 %s1968_s12, 4  ;;  %s1517_s30 = smov [#allocation7]   ;;  %s83_s29 = int_to_ptr.hbm [resolvable:$true] %s82_s29 }
   0xa   :  { %s65_s16 = sshll.u32 %s1517_s30, 4  ;;  %s1518_s1 = smov [#allocation8]   ;;  %s66_s16 = int_to_ptr.vmem [resolvable:$true] %s65_s16 }
   0xb   :  { %71 = dma.hbm_to_vmem [thread:$0]  %s64_s27, 256, %s66_s16, [#allocation6], %s1514_s21, %s1514_s21, %s1515_s22  }
   0xc   :  { %s84_s15 = sshll.u32 %s1518_s1, 4  ;;  %s85_s15 = int_to_ptr.vmem [resolvable:$true] %s84_s15 }
   0xd   :  { %90 = dma.hbm_to_vmem [thread:$0]  %s83_s29, 512, %s85_s15, [#allocation9], %s1514_s21, %s1514_s21, %s1515_s22  }
   0xe   :  { %1505 = dma.done.wait [#allocation3], 128  }
   0xf   :  { %1506 = vsyncadd [#allocation3], 4294967168 }
  0x10   :  { %1507 = dma.done.wait [#allocation6], 768  }
  0x11   :  { %1508 = vsyncadd [#allocation6], 4294966528 }
  0x12   :  { %1509 = dma.done.wait [#allocation9], 512  }
  0x13   :  { %1510 = vsyncadd [#allocation9], 4294966784  ;;  %v118_v0 = vld [vmem:[%s1958_s2 + $0x8] sm:$0xff]  ;;  %v117_v1 = vld [vmem:[%s1958_s2] sm:$0xff]  ;;  %vm123_vm0 = vcmask 130048   ;;  %s1519_s2 = smov 64  }
  0x14   :  { %162 = vmatpush.msra.mxu0 %v118_v0  ;;  %v109_v2 = vld [vmem:[%s1956_s0] sm:$0xff]  ;;  %s1520_s23 = smov 32   ;;  %v1636_v17 = vld [vmem:[%s1960_s4 + $0x18] sm:$0xff]  ;;  %v1646_v19 = vld [vmem:[%s1960_s4 + $0x10] sm:$0xff]  ;;  %vm261_vm1 = vcmask 261120   ;;  %s1521_s1 = smov 96  }
  0x15   :  { %v1624_v3 = vld [vmem:[%s1959_s3] ss:$0 sm:$0xff]  ;;  %v1641_v18 = vld [vmem:[%s1961_s5 + $0x18] sm:$0xff]  ;;  %276 = vmatpush.msra.mxu2 %v1636_v17  ;;  %v1653_v20 = vld [vmem:[%s1961_s5 + $0x10] sm:$0xff]  ;;  %s1523_s17 = smov [#allocation10]  }
  0x16   :  { %163 = vmatpush.msra.mxu0 %v117_v1  ;;  %297 = vmatpush.msra.mxu3 %v1641_v18  ;;  %v1658_v21 = vld [vmem:[%s1960_s4 + $0x8] sm:$0xff]  ;;  %v1670_v23 = vld [vmem:[%s1960_s4] sm:$0xff]  ;;  %v1719_v61 = vld [vmem:[#allocation5 + $0x10] sm:$0xff]  ;;  %s1220_s12 = sshll.u32 %s1523_s17, 4  ;;  %s1221_s12 = int_to_ptr.vmem [resolvable:$true] %s1220_s12 }
  0x17   :  { %1234 = vmatmul.msk.f32.vlgmr.msra.gmra.mxu0 %vm123_vm0, %v109_v2  ;;  %v1663_v22 = vld [vmem:[%s1961_s5 + $0x8] sm:$0xff]  ;;  %277 = vmatpush.msra.mxu2 %v1646_v19  ;;  %v1675_v24 = vld [vmem:[%s1961_s5] sm:$0xff]  ;;  %v191_v62 = vld [vmem:[#allocation7 + $0x8] sm:$0xff]  ;;  %s1222_s5 = sshll.u32 %s1970_s14, 4  ;;  %s1223_s5 = int_to_ptr.hbm [resolvable:$true] %s1222_s5 }
  0x18   :  { %298 = vmatpush.msra.mxu3 %v1653_v20  ;;  %v110_v27 = vld [vmem:[%s1956_s0 + $0x8] sm:$0xff]  ;;  %v1699_v29 = vld [vmem:[%s1963_s7] ss:$0 sm:$0xff]  ;;  %213 = vmatpush.msra.mxu1 %v191_v62  ;;  %v1722_v0 = vld [vmem:[#allocation5 + $0x8] sm:$0xff] }
  0x19   :  { %278 = vmatpush.msra.mxu2 %v1658_v21  ;;  %v1717_v60 = vld [vmem:[#allocation5 + $0x18] sm:$0xff]  ;;  %v190_v63 = vld [vmem:[#allocation7] sm:$0xff] }
  0x1a   :  { %299 = vmatpush.msra.mxu3 %v1663_v22  ;;  %214 = vmatpush.msra.mxu1 %v190_v63  ;;  %v1725_v1 = vld [vmem:[#allocation5] sm:$0xff] }
  0x1b   :  { %279 = vmatpush.msra.mxu2 %v1670_v23 }
  0x1c   :  { %300 = vmatpush.msra.mxu3 %v1675_v24  ;;  %368 = vmatpush.msrb.mxu1 %v1636_v17 }
  0x1d   :  { %393 = vmatpush.msrb.mxu2 %v1717_v60 }
  0x1e   :  { %413 = vmatpush.msrb.mxu3 %v1641_v18  ;;  %369 = vmatpush.msrb.mxu1 %v1646_v19 }
  0x1f   :  { %1235 = vmatmul.msk.f32.gmra.mxu0 %vm123_vm0, %v110_v27  ;;  %394 = vmatpush.msrb.mxu2 %v1719_v61 }
  0x20   :  { %414 = vmatpush.msrb.mxu3 %v1653_v20  ;;  %370 = vmatpush.msrb.mxu1 %v1658_v21 }
  0x21   :  { %395 = vmatpush.msrb.mxu2 %v1722_v0 }
  0x22   :  { %415 = vmatpush.msrb.mxu3 %v1663_v22  ;;  %371 = vmatpush.msrb.mxu1 %v1670_v23 }
  0x23   :  { %396 = vmatpush.msrb.mxu2 %v1725_v1 }
  0x24   :  { %416 = vmatpush.msrb.mxu3 %v1675_v24 }
  0x94   :  { %v165_v4 = vpop.f32.mrf.mxu0 }
  0x95   :  { %v166_v5 = vadd.f32 %v1624_v3, %v165_v4 }
  0x97   :  { %1283 = vtanh.f32 %v166_v5  ;;  %v236_v7 = vmul.f32 0.5, %v166_v5  ;;  %v189_v5 = vld [vmem:[#allocation2] sm:$0xff] }
  0x98   :  { %1242 = vmatmul.msk.f32.vlgmr.msra.gmra.mxu1 %vm123_vm0, %v189_v5 }
  0x99   :  { %1285 = vtanh.f32 %v236_v7  ;;  %484 = vmatpush.msra.mxu1 %v1636_v17 }
  0x9b   :  { %485 = vmatpush.msra.mxu1 %v1646_v19 }
  0x9c   :  { %v168_v31 = vpop.f32.mrf.mxu0 }
  0x9d   :  { %v1284_v6 = vpop.eup %1283  ;;  %v169_v33 = vadd.f32 %v1624_v3, %v168_v31  ;;  %486 = vmatpush.msra.mxu1 %v1658_v21 }
  0x9e   :  { %243 = vrot.lane.b32.xlu0 %v1284_v6, %s1519_s2  ;;  %v111_v6 = vld [vmem:[%s1956_s0 + $0x10] sm:$0xff] }
  0x9f   :  { %v1286_v8 = vpop.eup %1285  ;;  %1236 = vmatmul.msk.f32.gmra.mxu0 %vm123_vm0, %v111_v6  ;;  %487 = vmatpush.msra.mxu1 %v1670_v23 }
  0xa0   :  { %v238_v9 = vadd.f32 1.0, %v1286_v8 }
  0xa2   :  { %v239_v10 = vmul.f32 0.5, %v238_v9 }
  0xa4   :  { %v241_v13 = vmul.f32 0.0, %v239_v10 }
 0x110   :  { %v244_v11 = vpop.permute.xlu0 %243 }
 0x111   :  { %v246_v12 = vmul.f32 %v244_v11, %v239_v10 }
 0x113   :  { %248 = vrot.lane.b32.xlu0 %v246_v12, %s1520_s23 }
 0x115   :  { %v1762_v9 = vpop.f32.mrf.mxu1 }
 0x185   :  { %v249_v14 = vpop.permute.xlu0 %248 }
 0x186   :  { %v1629_v15 = vadd.f32 %v249_v14, %v241_v13 }
 0x188   :  { %1287 = vtanh.f32 %v1629_v15 }
 0x18e   :  { %v1288_v16 = vpop.eup %1287 }
 0x18f   :  { %254 = vrot.lane.b32.xlu1 %v1288_v16, %s1519_s2 }
 0x201   :  { %v255_v25 = vpop.permute.xlu1 %254 }
 0x202   :  { %v257_v26 = vmul.f32 %v255_v25, %v239_v10  ;;  %v171_v10 = vpop.f32.mrf.mxu0 }
 0x203   :  { %v172_v11 = vadd.f32 %v1624_v3, %v171_v10 }
 0x204   :  { %259 = vrot.lane.b32.xlu1 %v257_v26, %s1520_s23 }
 0x276   :  { %v260_v28 = vpop.permute.xlu1 %259 }
 0x277   :  { %1243 = vmatmul.msk.f32.vlgmr.msra.gmra.mxu2 %vm261_vm1, %v260_v28  ;;  %1244 = vmatmul.msk.f32.vlgmr.msra.gmra.mxu3 %vm261_vm1, %v260_v28 }
 0x278   :  { %529 = vmatpush.msra.mxu3 %v1641_v18  ;;  %509 = vmatpush.msra.mxu2 %v1717_v60 }
 0x27a   :  { %530 = vmatpush.msra.mxu3 %v1653_v20  ;;  %510 = vmatpush.msra.mxu2 %v1719_v61 }
 0x27c   :  { %531 = vmatpush.msra.mxu3 %v1663_v22  ;;  %511 = vmatpush.msra.mxu2 %v1722_v0 }
 0x27e   :  { %532 = vmatpush.msra.mxu3 %v1675_v24  ;;  %512 = vmatpush.msra.mxu2 %v1725_v1 }
 0x2fa   :  { %v302_v30 = vpop.f32.mrf.mxu3  ;;  %v281_v34 = vpop.f32.mrf.mxu2 }
 0x2fb   :  { %v305_v32 = vadd.f32 %v1699_v29, %v302_v30  ;;  %v328_v35 = vadd.f32 %v281_v34, %v169_v33 }
 0x2fd   :  { %1289 = vtanh.f32 %v305_v32  ;;  %v306_v38 = vmul.f32 0.5, %v305_v32  ;;  %v329_v39 = vmul.f32 0.5, %v328_v35 }
 0x2fe   :  { %1291 = vtanh.f32 %v328_v35 }
 0x2ff   :  { %1293 = vtanh.f32 %v306_v38 }
 0x300   :  { %1295 = vtanh.f32 %v329_v39 }
 0x303   :  { %v1290_v36 = vpop.eup %1289 }
 0x304   :  { %313 = vrot.lane.b32.xlu2 %v1290_v36, %s1519_s2  ;;  %v1292_v37 = vpop.eup %1291 }
 0x305   :  { %v1294_v40 = vpop.eup %1293 }
 0x306   :  { %v308_v41 = vadd.f32 1.0, %v1294_v40  ;;  %v1296_v43 = vpop.eup %1295 }
 0x307   :  { %v331_v46 = vadd.f32 1.0, %v1296_v43 }
 0x308   :  { %v309_v42 = vmul.f32 0.5, %v308_v41 }
 0x309   :  { %v332_v47 = vmul.f32 0.5, %v331_v46 }
 0x30a   :  { %v311_v50 = vmul.f32 0.0, %v309_v42 }
 0x30b   :  { %v334_v53 = vmul.f32 %v332_v47, %v1629_v15 }
 0x30c   :  { %336 = vrot.lane.b32.xlu2 %v1292_v37, %s1519_s2 }
 0x35e   :  { %v314_v44 = vpop.permute.xlu2 %313 }
 0x35f   :  { %v316_v45 = vmul.f32 %v314_v44, %v309_v42 }
 0x361   :  { %318 = vrot.lane.b32.xlu0 %v316_v45, %s1520_s23 }
 0x366   :  { %v337_v48 = vpop.permute.xlu2 %336 }
 0x367   :  { %v339_v49 = vmul.f32 %v337_v48, %v332_v47 }
 0x369   :  { %341 = vrot.lane.b32.xlu1 %v339_v49, %s1520_s23  ;;  %v112_v49 = vld [vmem:[%s1956_s0 + $0x18] sm:$0xff] }
 0x36a   :  { %1237 = vmatmul.msk.f32.gmra.mxu0 %vm123_vm0, %v112_v49 }
 0x3d3   :  { %v319_v51 = vpop.permute.xlu0 %318 }
 0x3d4   :  { %v1707_v52 = vadd.f32 %v319_v51, %v311_v50 }
 0x3d6   :  { %1297 = vtanh.f32 %v1707_v52 }
 0x3db   :  { %v342_v54 = vpop.permute.xlu1 %341 }
 0x3dc   :  { %v1298_v55 = vpop.eup %1297  ;;  %v1711_v56 = vadd.f32 %v342_v54, %v334_v53 }
 0x3dd   :  { %324 = vrot.lane.b32.xlu2 %v1298_v55, %s1519_s2 }
 0x3de   :  { %1299 = vtanh.f32 %v1711_v56 }
 0x3e4   :  { %v1300_v57 = vpop.eup %1299 }
 0x3e5   :  { %347 = vrot.lane.b32.xlu0 %v1300_v57, %s1519_s2 }
 0x437   :  { %v325_v58 = vpop.permute.xlu2 %324 }
 0x438   :  { %v327_v59 = vmul.f32 %v325_v58, %v309_v42 }
 0x43a   :  { %377 = vrot.lane.b32.xlu1 %v327_v59, %s1520_s23 }
 0x457   :  { %v348_v2 = vpop.permute.xlu0 %347 }
 0x458   :  { %v350_v4 = vmul.f32 %v348_v2, %v332_v47 }
 0x45a   :  { %352 = vrot.lane.b32.xlu2 %v350_v4, %s1520_s23 }
 0x4ac   :  { %v378_v7 = vpop.permute.xlu1 %377 }
 0x4ad   :  { %1246 = vmatmul.msk.f32.vlgmr.msrb.gmra.mxu2 %vm261_vm1, %v378_v7 }
 0x4ae   :  { %625 = vmatpush.msrb.mxu2 %v1717_v60 }
 0x4b0   :  { %626 = vmatpush.msrb.mxu2 %v1719_v61 }
 0x4b2   :  { %627 = vmatpush.msrb.mxu2 %v1722_v0 }
 0x4b4   :  { %v353_v8 = vpop.permute.xlu2 %352  ;;  %628 = vmatpush.msrb.mxu2 %v1725_v1 }
 0x4b5   :  { %1245 = vmatmul.msk.f32.vlgmr.msrb.gmra.mxu1 %vm261_vm1, %v353_v8  ;;  %1247 = vmatmul.msk.f32.vlgmr.msrb.gmra.mxu3 %vm261_vm1, %v353_v8 }
 0x4b6   :  { %645 = vmatpush.msrb.mxu3 %v1641_v18  ;;  %600 = vmatpush.msrb.mxu1 %v1636_v17 }
 0x4b8   :  { %646 = vmatpush.msrb.mxu3 %v1653_v20  ;;  %601 = vmatpush.msrb.mxu1 %v1646_v19 }
 0x4ba   :  { %647 = vmatpush.msrb.mxu3 %v1663_v22  ;;  %602 = vmatpush.msrb.mxu1 %v1658_v21 }
 0x4bc   :  { %648 = vmatpush.msrb.mxu3 %v1675_v24  ;;  %603 = vmatpush.msrb.mxu1 %v1670_v23 }
 0x530   :  { %v398_v14 = vpop.f32.mrf.mxu2 }
 0x531   :  { %v399_v15 = vadd.f32 %v1699_v29, %v398_v14 }
 0x532   :  { %v373_v12 = vpop.f32.mrf.mxu1 }
 0x533   :  { %v444_v13 = vadd.f32 %v373_v12, %v172_v11 }
 0x535   :  { %1301 = vtanh.f32 %v444_v13  ;;  %v445_v28 = vmul.f32 0.5, %v444_v13 }
 0x538   :  { %v418_v16 = vpop.f32.mrf.mxu3 }
 0x539   :  { %v421_v25 = vadd.f32 %v418_v16, %v399_v15 }
 0x53b   :  { %v1302_v26 = vpop.eup %1301  ;;  %1303 = vtanh.f32 %v421_v25  ;;  %v422_v30 = vmul.f32 0.5, %v421_v25 }
 0x53c   :  { %452 = vrot.lane.b32.xlu1 %v1302_v26, %s1519_s2  ;;  %1305 = vtanh.f32 %v445_v28 }
 0x53d   :  { %1307 = vtanh.f32 %v422_v30 }
 0x541   :  { %v1304_v27 = vpop.eup %1303 }
 0x542   :  { %429 = vrot.lane.b32.xlu0 %v1304_v27, %s1519_s2  ;;  %v1306_v31 = vpop.eup %1305 }
 0x543   :  { %v447_v32 = vadd.f32 1.0, %v1306_v31  ;;  %v1308_v33 = vpop.eup %1307 }
 0x544   :  { %v424_v36 = vadd.f32 1.0, %v1308_v33 }
 0x545   :  { %v448_v34 = vmul.f32 0.5, %v447_v32 }
 0x546   :  { %v425_v38 = vmul.f32 0.5, %v424_v36 }
 0x547   :  { %v450_v45 = vmul.f32 %v448_v34, %v1711_v56  ;;  %v174_v56 = vpop.f32.mrf.mxu0 }
 0x548   :  { %v427_v41 = vmul.f32 %v425_v38, %v1707_v52  ;;  %v175_v57 = vadd.f32 %v1624_v3, %v174_v56 }
 0x5ae   :  { %v453_v35 = vpop.permute.xlu1 %452 }
 0x5af   :  { %v455_v37 = vmul.f32 %v453_v35, %v448_v34 }
 0x5b1   :  { %457 = vrot.lane.b32.xlu0 %v455_v37, %s1520_s23 }
 0x5b4   :  { %v430_v39 = vpop.permute.xlu0 %429 }
 0x5b5   :  { %v432_v40 = vmul.f32 %v430_v39, %v425_v38 }
 0x5b7   :  { %434 = vrot.lane.b32.xlu2 %v432_v40, %s1520_s23 }
 0x611   :  { %v435_v42 = vpop.permute.xlu2 %434 }
 0x612   :  { %v1771_v43 = vadd.f32 %v435_v42, %v427_v41  ;;  %v113_v41 = vld [vmem:[%s1956_s0 + $0x20] sm:$0xff] }
 0x613   :  { %1238 = vmatmul.msk.f32.gmra.mxu0 %vm123_vm0, %v113_v41 }
 0x614   :  { %1309 = vtanh.f32 %v1771_v43 }
 0x61a   :  { %v1310_v44 = vpop.eup %1309 }
 0x61b   :  { %440 = vrot.lane.b32.xlu1 %v1310_v44, %s1519_s2 }
 0x623   :  { %v458_v46 = vpop.permute.xlu0 %457 }
 0x624   :  { %v460_v47 = vadd.f32 %v458_v46, %v450_v45 }
 0x626   :  { %1311 = vtanh.f32 %v460_v47 }
 0x62c   :  { %v1312_v48 = vpop.eup %1311 }
 0x62d   :  { %463 = vrot.lane.b32.xlu2 %v1312_v48, %s1519_s2 }
 0x687   :  { %v464_v50 = vpop.permute.xlu2 %463 }
 0x688   :  { %v466_v51 = vmul.f32 %v464_v50, %v448_v34 }
 0x68a   :  { %468 = vrot.lane.b32.xlu1 %v466_v51, %s1520_s23 }
 0x68d   :  { %v441_v52 = vpop.permute.xlu1 %440 }
 0x68e   :  { %v443_v53 = vmul.f32 %v441_v52, %v425_v38 }
 0x690   :  { %493 = vrot.lane.b32.xlu0 %v443_v53, %s1520_s23  ;;  %v177_v44 = vpop.f32.mrf.mxu0 }
 0x691   :  { %v178_v45 = vadd.f32 %v1624_v3, %v177_v44 }
 0x6fc   :  { %v469_v54 = vpop.permute.xlu1 %468 }
 0x6fd   :  { %1248 = vmatmul.msk.f32.vlgmr.msra.gmra.mxu1 %vm261_vm1, %v469_v54  ;;  %1250 = vmatmul.msk.f32.vlgmr.msra.gmra.mxu3 %vm261_vm1, %v469_v54 }
 0x6fe   :  { %716 = vmatpush.msra.mxu1 %v1636_v17  ;;  %761 = vmatpush.msra.mxu3 %v1641_v18 }
 0x700   :  { %717 = vmatpush.msra.mxu1 %v1646_v19  ;;  %762 = vmatpush.msra.mxu3 %v1653_v20 }
 0x702   :  { %v494_v55 = vpop.permute.xlu0 %493  ;;  %718 = vmatpush.msra.mxu1 %v1658_v21  ;;  %763 = vmatpush.msra.mxu3 %v1663_v22 }
 0x703   :  { %1249 = vmatmul.msk.f32.vlgmr.msra.gmra.mxu2 %vm261_vm1, %v494_v55 }
 0x704   :  { %719 = vmatpush.msra.mxu1 %v1670_v23  ;;  %764 = vmatpush.msra.mxu3 %v1675_v24 }
 0x705   :  { %741 = vmatpush.msra.mxu2 %v1717_v60 }
 0x707   :  { %742 = vmatpush.msra.mxu2 %v1719_v61 }
 0x709   :  { %743 = vmatpush.msra.mxu2 %v1722_v0 }
 0x70b   :  { %744 = vmatpush.msra.mxu2 %v1725_v1 }
 0x77a   :  { %v489_v58 = vpop.f32.mrf.mxu1 }
 0x77b   :  { %v560_v59 = vadd.f32 %v489_v58, %v175_v57 }
 0x77d   :  { %1313 = vtanh.f32 %v560_v59  ;;  %v561_v10 = vmul.f32 0.5, %v560_v59 }
 0x780   :  { %v534_v4 = vpop.f32.mrf.mxu3 }
 0x783   :  { %v1314_v62 = vpop.eup %1313 }
 0x784   :  { %568 = vrot.lane.b32.xlu0 %v1314_v62, %s1519_s2 }
 0x786   :  { %v514_v63 = vpop.f32.mrf.mxu2 }
 0x787   :  { %v515_v2 = vadd.f32 %v1699_v29, %v514_v63 }
 0x789   :  { %v537_v5 = vadd.f32 %v534_v4, %v515_v2 }
 0x78b   :  { %1315 = vtanh.f32 %v537_v5  ;;  %v538_v7 = vmul.f32 0.5, %v537_v5 }
 0x78d   :  { %1317 = vtanh.f32 %v538_v7 }
 0x78e   :  { %1319 = vtanh.f32 %v561_v10 }
 0x791   :  { %v1316_v6 = vpop.eup %1315 }
 0x792   :  { %545 = vrot.lane.b32.xlu2 %v1316_v6, %s1519_s2 }
 0x793   :  { %v1318_v8 = vpop.eup %1317 }
 0x794   :  { %v540_v11 = vadd.f32 1.0, %v1318_v8  ;;  %v1320_v15 = vpop.eup %1319 }
 0x795   :  { %v563_v16 = vadd.f32 1.0, %v1320_v15 }
 0x796   :  { %v541_v12 = vmul.f32 0.5, %v540_v11 }
 0x797   :  { %v564_v25 = vmul.f32 0.5, %v563_v16  ;;  %v114_v16 = vld [vmem:[%s1956_s0 + $0x28] sm:$0xff] }
 0x798   :  { %v543_v33 = vmul.f32 %v541_v12, %v1771_v43  ;;  %1239 = vmatmul.msk.f32.gmra.mxu0 %vm123_vm0, %v114_v16 }
 0x799   :  { %v566_v28 = vmul.f32 %v564_v25, %v460_v47 }
 0x7ec   :  { %v546_v13 = vpop.permute.xlu2 %545 }
 0x7ed   :  { %v548_v14 = vmul.f32 %v546_v13, %v541_v12 }
 0x7ef   :  { %550 = vrot.lane.b32.xlu1 %v548_v14, %s1520_s23 }
 0x7f6   :  { %v569_v26 = vpop.permute.xlu0 %568 }
 0x7f7   :  { %v571_v27 = vmul.f32 %v569_v26, %v564_v25 }
 0x7f9   :  { %573 = vrot.lane.b32.xlu2 %v571_v27, %s1520_s23 }
 0x853   :  { %v574_v30 = vpop.permute.xlu2 %573 }
 0x854   :  { %v1804_v31 = vadd.f32 %v574_v30, %v566_v28 }
 0x856   :  { %1321 = vtanh.f32 %v1804_v31 }
 0x85c   :  { %v1322_v32 = vpop.eup %1321 }
 0x85d   :  { %579 = vrot.lane.b32.xlu1 %v1322_v32, %s1519_s2 }
 0x861   :  { %v551_v34 = vpop.permute.xlu1 %550 }
 0x862   :  { %v1809_v35 = vadd.f32 %v551_v34, %v543_v33 }
 0x864   :  { %1323 = vtanh.f32 %v1809_v35 }
 0x86a   :  { %v1324_v36 = vpop.eup %1323 }
 0x86b   :  { %556 = vrot.lane.b32.xlu0 %v1324_v36, %s1519_s2 }
 0x8cf   :  { %v580_v37 = vpop.permute.xlu1 %579 }
 0x8d0   :  { %v582_v38 = vmul.f32 %v580_v37, %v564_v25 }
 0x8d2   :  { %584 = vrot.lane.b32.xlu0 %v582_v38, %s1520_s23 }
 0x8dd   :  { %v557_v39 = vpop.permute.xlu0 %556 }
 0x8de   :  { %v559_v40 = vmul.f32 %v557_v39, %v541_v12 }
 0x8e0   :  { %609 = vrot.lane.b32.xlu2 %v559_v40, %s1520_s23 }
 0x93a   :  { %v610_v42 = vpop.permute.xlu2 %609 }
 0x93b   :  { %1252 = vmatmul.msk.f32.vlgmr.msrb.gmra.mxu2 %vm261_vm1, %v610_v42 }
 0x93c   :  { %857 = vmatpush.msrb.mxu2 %v1717_v60 }
 0x93e   :  { %858 = vmatpush.msrb.mxu2 %v1719_v61 }
 0x940   :  { %859 = vmatpush.msrb.mxu2 %v1722_v0 }
 0x942   :  { %860 = vmatpush.msrb.mxu2 %v1725_v1 }
 0x944   :  { %v585_v43 = vpop.permute.xlu0 %584 }
 0x945   :  { %1251 = vmatmul.msk.f32.vlgmr.msrb.gmra.mxu1 %vm261_vm1, %v585_v43  ;;  %1253 = vmatmul.msk.f32.vlgmr.msrb.gmra.mxu3 %vm261_vm1, %v585_v43 }
 0x946   :  { %832 = vmatpush.msrb.mxu1 %v1636_v17  ;;  %877 = vmatpush.msrb.mxu3 %v1641_v18 }
 0x948   :  { %833 = vmatpush.msrb.mxu1 %v1646_v19  ;;  %878 = vmatpush.msrb.mxu3 %v1653_v20 }
 0x94a   :  { %834 = vmatpush.msrb.mxu1 %v1658_v21  ;;  %879 = vmatpush.msrb.mxu3 %v1663_v22 }
 0x94c   :  { %835 = vmatpush.msrb.mxu1 %v1670_v23  ;;  %880 = vmatpush.msrb.mxu3 %v1675_v24 }
 0x9be   :  { %v630_v48 = vpop.f32.mrf.mxu2 }
 0x9bf   :  { %v631_v49 = vadd.f32 %v1699_v29, %v630_v48 }
 0x9c2   :  { %v605_v46 = vpop.f32.mrf.mxu1 }
 0x9c3   :  { %v676_v47 = vadd.f32 %v605_v46, %v178_v45 }
 0x9c5   :  { %1325 = vtanh.f32 %v676_v47  ;;  %v677_v54 = vmul.f32 0.5, %v676_v47 }
 0x9c8   :  { %v650_v50 = vpop.f32.mrf.mxu3 }
 0x9c9   :  { %v653_v51 = vadd.f32 %v650_v50, %v631_v49 }
 0x9cb   :  { %v1326_v52 = vpop.eup %1325  ;;  %1327 = vtanh.f32 %v653_v51  ;;  %v654_v62 = vmul.f32 0.5, %v653_v51 }
 0x9cc   :  { %684 = vrot.lane.b32.xlu2 %v1326_v52, %s1519_s2  ;;  %1329 = vtanh.f32 %v677_v54 }
 0x9cd   :  { %1331 = vtanh.f32 %v654_v62  ;;  %v115_v62 = vld [vmem:[%s1956_s0 + $0x30] sm:$0xff] }
 0x9ce   :  { %1240 = vmatmul.msk.f32.gmra.mxu0 %vm123_vm0, %v115_v62 }
 0x9d1   :  { %v1328_v53 = vpop.eup %1327 }
 0x9d2   :  { %661 = vrot.lane.b32.xlu1 %v1328_v53, %s1519_s2  ;;  %v1330_v55 = vpop.eup %1329 }
 0x9d3   :  { %v679_v56 = vadd.f32 1.0, %v1330_v55  ;;  %v1332_v63 = vpop.eup %1331 }
 0x9d4   :  { %v656_v2 = vadd.f32 1.0, %v1332_v63 }
 0x9d5   :  { %v680_v57 = vmul.f32 0.5, %v679_v56 }
 0x9d6   :  { %v657_v4 = vmul.f32 0.5, %v656_v2 }
 0x9d7   :  { %v682_v7 = vmul.f32 %v680_v57, %v1804_v31 }
 0x9d8   :  { %v659_v12 = vmul.f32 %v657_v4, %v1809_v35 }
 0xa26   :  { %v685_v58 = vpop.permute.xlu2 %684 }
 0xa27   :  { %v687_v59 = vmul.f32 %v685_v58, %v680_v57 }
 0xa29   :  { %689 = vrot.lane.b32.xlu1 %v687_v59, %s1520_s23 }
 0xa44   :  { %v662_v5 = vpop.permute.xlu1 %661 }
 0xa45   :  { %v664_v6 = vmul.f32 %v662_v5, %v657_v4 }
 0xa47   :  { %666 = vrot.lane.b32.xlu0 %v664_v6, %s1520_s23 }
 0xa9b   :  { %v690_v8 = vpop.permute.xlu1 %689 }
 0xa9c   :  { %v1841_v10 = vadd.f32 %v690_v8, %v682_v7 }
 0xa9e   :  { %1333 = vtanh.f32 %v1841_v10 }
 0xaa4   :  { %v1334_v11 = vpop.eup %1333 }
 0xaa5   :  { %695 = vrot.lane.b32.xlu0 %v1334_v11, %s1519_s2 }
 0xab9   :  { %v667_v13 = vpop.permute.xlu0 %666 }
 0xaba   :  { %v1846_v14 = vadd.f32 %v667_v13, %v659_v12 }
 0xabc   :  { %1335 = vtanh.f32 %v1846_v14 }
 0xac2   :  { %v1336_v15 = vpop.eup %1335 }
 0xac3   :  { %672 = vrot.lane.b32.xlu2 %v1336_v15, %s1519_s2 }
 0xb17   :  { %v696_v25 = vpop.permute.xlu0 %695 }
 0xb18   :  { %v698_v26 = vmul.f32 %v696_v25, %v680_v57 }
 0xb1a   :  { %700 = vrot.lane.b32.xlu2 %v698_v26, %s1520_s23 }
 0xb1d   :  { %v673_v27 = vpop.permute.xlu2 %672 }
 0xb1e   :  { %v675_v28 = vmul.f32 %v673_v27, %v657_v4 }
 0xb20   :  { %725 = vrot.lane.b32.xlu1 %v675_v28, %s1520_s23 }
 0xb74   :  { %v701_v30 = vpop.permute.xlu2 %700 }
 0xb75   :  { %1254 = vmatmul.msk.f32.vlgmr.msra.gmra.mxu1 %vm261_vm1, %v701_v30  ;;  %1256 = vmatmul.msk.f32.vlgmr.msra.gmra.mxu3 %vm261_vm1, %v701_v30 }
 0xb76   :  { %948 = vmatpush.msra.mxu1 %v1636_v17  ;;  %993 = vmatpush.msra.mxu3 %v1641_v18  ;;  %v180_v17 = vpop.f32.mrf.mxu0 }
 0xb78   :  { %949 = vmatpush.msra.mxu1 %v1646_v19  ;;  %994 = vmatpush.msra.mxu3 %v1653_v20  ;;  %v181_v19 = vadd.f32 %v1624_v3, %v180_v17 }
 0xb7a   :  { %950 = vmatpush.msra.mxu1 %v1658_v21  ;;  %995 = vmatpush.msra.mxu3 %v1663_v22 }
 0xb7c   :  { %951 = vmatpush.msra.mxu1 %v1670_v23  ;;  %996 = vmatpush.msra.mxu3 %v1675_v24 }
 0xb7e   :  { %v183_v6 = vpop.f32.mrf.mxu0 }
 0xb92   :  { %v726_v31 = vpop.permute.xlu1 %725 }
 0xb93   :  { %1255 = vmatmul.msk.f32.vlgmr.msra.gmra.mxu2 %vm261_vm1, %v726_v31 }
 0xb94   :  { %973 = vmatpush.msra.mxu2 %v1717_v60 }
 0xb96   :  { %974 = vmatpush.msra.mxu2 %v1719_v61 }
 0xb98   :  { %975 = vmatpush.msra.mxu2 %v1722_v0 }
 0xb9a   :  { %976 = vmatpush.msra.mxu2 %v1725_v1 }
 0xbf2   :  { %v721_v21 = vpop.f32.mrf.mxu1 }
 0xbf3   :  { %v792_v32 = vadd.f32 %v721_v21, %v181_v19 }
 0xbf5   :  { %1337 = vtanh.f32 %v792_v32  ;;  %v793_v38 = vmul.f32 0.5, %v792_v32 }
 0xbf8   :  { %v766_v35 = vpop.f32.mrf.mxu3 }
 0xbfb   :  { %v1338_v23 = vpop.eup %1337 }
 0xbfc   :  { %800 = vrot.lane.b32.xlu1 %v1338_v23, %s1519_s2 }
 0xc16   :  { %v746_v33 = vpop.f32.mrf.mxu2 }
 0xc17   :  { %v747_v34 = vadd.f32 %v1699_v29, %v746_v33 }
 0xc19   :  { %v769_v36 = vadd.f32 %v766_v35, %v747_v34 }
 0xc1b   :  { %1339 = vtanh.f32 %v769_v36  ;;  %v770_v44 = vmul.f32 0.5, %v769_v36  ;;  %v116_v36 = vld [vmem:[%s1956_s0 + $0x38] sm:$0xff] }
 0xc1c   :  { %1341 = vtanh.f32 %v793_v38  ;;  %1241 = vmatmul.msk.f32.gmra.mxu0 %vm123_vm0, %v116_v36  ;;  %v1522_v36 = vmov 32.0  }
 0xc1d   :  { %1343 = vtanh.f32 %v770_v44 }
 0xc21   :  { %v1340_v37 = vpop.eup %1339 }
 0xc22   :  { %777 = vrot.lane.b32.xlu0 %v1340_v37, %s1519_s2  ;;  %v1342_v39 = vpop.eup %1341 }
 0xc23   :  { %v795_v40 = vadd.f32 1.0, %v1342_v39  ;;  %v1344_v45 = vpop.eup %1343 }
 0xc24   :  { %v772_v46 = vadd.f32 1.0, %v1344_v45 }
 0xc25   :  { %v796_v41 = vmul.f32 0.5, %v795_v40 }
 0xc26   :  { %v773_v47 = vmul.f32 0.5, %v772_v46 }
 0xc27   :  { %v798_v50 = vmul.f32 %v796_v41, %v1841_v10 }
 0xc28   :  { %v775_v54 = vmul.f32 %v773_v47, %v1846_v14 }
 0xc6e   :  { %v801_v42 = vpop.permute.xlu1 %800 }
 0xc6f   :  { %v803_v43 = vmul.f32 %v801_v42, %v796_v41 }
 0xc71   :  { %805 = vrot.lane.b32.xlu0 %v803_v43, %s1520_s23 }
 0xc94   :  { %v778_v48 = vpop.permute.xlu0 %777 }
 0xc95   :  { %v780_v49 = vmul.f32 %v778_v48, %v773_v47 }
 0xc97   :  { %782 = vrot.lane.b32.xlu2 %v780_v49, %s1520_s23 }
 0xce3   :  { %v806_v51 = vpop.permute.xlu0 %805 }
 0xce4   :  { %v808_v52 = vadd.f32 %v806_v51, %v798_v50 }
 0xce6   :  { %1345 = vtanh.f32 %v808_v52 }
 0xcec   :  { %v1346_v53 = vpop.eup %1345 }
 0xced   :  { %811 = vrot.lane.b32.xlu2 %v1346_v53, %s1519_s2 }
 0xcf1   :  { %v783_v55 = vpop.permute.xlu2 %782 }
 0xcf2   :  { %v785_v56 = vadd.f32 %v783_v55, %v775_v54 }
 0xcf4   :  { %1347 = vtanh.f32 %v785_v56 }
 0xcfa   :  { %v1348_v57 = vpop.eup %1347 }
 0xcfb   :  { %788 = vrot.lane.b32.xlu1 %v1348_v57, %s1519_s2 }
 0xd47   :  { %v812_v58 = vpop.permute.xlu2 %811 }
 0xd48   :  { %v814_v59 = vmul.f32 %v812_v58, %v796_v41  ;;  %v186_v41 = vpop.f32.mrf.mxu0 }
 0xd49   :  { %v187_v42 = vadd.f32 %v1624_v3, %v186_v41 }
 0xd4a   :  { %816 = vrot.lane.b32.xlu1 %v814_v59, %s1520_s23 }
 0xd6d   :  { %v789_v63 = vpop.permute.xlu1 %788 }
 0xd6e   :  { %v791_v2 = vmul.f32 %v789_v63, %v773_v47 }
 0xd70   :  { %841 = vrot.lane.b32.xlu0 %v791_v2, %s1520_s23 }
 0xdbc   :  { %v817_v4 = vpop.permute.xlu1 %816 }
 0xdbd   :  { %1257 = vmatmul.msk.f32.vlgmr.msrb.gmra.mxu1 %vm261_vm1, %v817_v4  ;;  %1259 = vmatmul.msk.f32.vlgmr.msrb.gmra.mxu3 %vm261_vm1, %v817_v4 }
 0xdbe   :  { %1064 = vmatpush.msrb.mxu1 %v1717_v60  ;;  %v184_v60 = vadd.f32 %v1624_v3, %v183_v6 }
 0xdc0   :  { %1065 = vmatpush.msrb.mxu1 %v1719_v61 }
 0xdc2   :  { %1066 = vmatpush.msrb.mxu1 %v1722_v0 }
 0xdc4   :  { %1067 = vmatpush.msrb.mxu1 %v1725_v1 }
 0xde2   :  { %v842_v5 = vpop.permute.xlu0 %841 }
 0xde3   :  { %1258 = vmatmul.msk.f32.vlgmr.msrb.gmra.mxu2 %vm261_vm1, %v842_v5 }
 0xde4   :  { %1089 = vmatpush.msrb.mxu2 %v1641_v18 }
 0xde6   :  { %1090 = vmatpush.msrb.mxu2 %v1653_v20 }
 0xde8   :  { %1091 = vmatpush.msrb.mxu2 %v1663_v22 }
 0xdea   :  { %1092 = vmatpush.msrb.mxu2 %v1675_v24 }
 0xe3a   :  { %v837_v7 = vpop.f32.mrf.mxu1 }
 0xe3b   :  { %v908_v61 = vadd.f32 %v837_v7, %v184_v60 }
 0xe3d   :  { %1349 = vtanh.f32 %v908_v61  ;;  %v909_v22 = vmul.f32 0.5, %v908_v61 }
 0xe40   :  { %v882_v10 = vpop.f32.mrf.mxu3 }
 0xe43   :  { %v1350_v0 = vpop.eup %1349 }
 0xe44   :  { %916 = vrot.lane.b32.xlu0 %v1350_v0, %s1519_s2 }
 0xe66   :  { %v862_v1 = vpop.f32.mrf.mxu2 }
 0xe67   :  { %v863_v8 = vadd.f32 %v1699_v29, %v862_v1 }
 0xe69   :  { %v885_v18 = vadd.f32 %v882_v10, %v863_v8 }
 0xe6b   :  { %1351 = vtanh.f32 %v885_v18  ;;  %v886_v15 = vmul.f32 0.5, %v885_v18 }
 0xe6c   :  { %1353 = vtanh.f32 %v909_v22 }
 0xe6d   :  { %1355 = vtanh.f32 %v886_v15  ;;  %v1279_v15 = vld [vmem:[%s1965_s9] ss:$0 sm:$0xff] }
 0xe71   :  { %v1352_v20 = vpop.eup %1351 }
 0xe72   :  { %893 = vrot.lane.b32.xlu2 %v1352_v20, %s1519_s2  ;;  %v1354_v24 = vpop.eup %1353 }
 0xe73   :  { %v911_v11 = vadd.f32 1.0, %v1354_v24  ;;  %v1356_v16 = vpop.eup %1355 }
 0xe74   :  { %v888_v25 = vadd.f32 1.0, %v1356_v16  ;;  %v217_v16 = vadd.f32 %v1279_v15, %v1762_v9 }
 0xe75   :  { %v912_v12 = vmul.f32 0.5, %v911_v11 }
 0xe76   :  { %v889_v26 = vmul.f32 0.5, %v888_v25 }
 0xe77   :  { %v914_v30 = vmul.f32 %v912_v12, %v808_v52 }
 0xe78   :  { %v891_v21 = vmul.f32 %v889_v26, %v785_v56 }
 0xeb6   :  { %v917_v13 = vpop.permute.xlu0 %916 }
 0xeb7   :  { %v919_v14 = vmul.f32 %v917_v13, %v912_v12 }
 0xeb9   :  { %921 = vrot.lane.b32.xlu2 %v919_v14, %s1520_s23 }
 0xecc   :  { %v894_v27 = vpop.permute.xlu2 %893 }
 0xecd   :  { %v896_v28 = vmul.f32 %v894_v27, %v889_v26 }
 0xecf   :  { %898 = vrot.lane.b32.xlu1 %v896_v28, %s1520_s23 }
 0xf13   :  { %v922_v31 = vpop.permute.xlu2 %921 }
 0xf14   :  { %v924_v17 = vadd.f32 %v922_v31, %v914_v30 }
 0xf16   :  { %1357 = vtanh.f32 %v924_v17 }
 0xf1c   :  { %v1358_v19 = vpop.eup %1357 }
 0xf1d   :  { %927 = vrot.lane.b32.xlu1 %v1358_v19, %s1519_s2 }
 0xf41   :  { %v899_v32 = vpop.permute.xlu1 %898 }
 0xf42   :  { %v901_v23 = vadd.f32 %v899_v32, %v891_v21 }
 0xf44   :  { %1359 = vtanh.f32 %v901_v23 }
 0xf4a   :  { %v1360_v33 = vpop.eup %1359 }
 0xf4b   :  { %904 = vrot.lane.b32.xlu0 %v1360_v33, %s1519_s2 }
 0xf8f   :  { %v928_v34 = vpop.permute.xlu1 %927 }
 0xf90   :  { %v930_v35 = vmul.f32 %v928_v34, %v912_v12 }
 0xf92   :  { %932 = vrot.lane.b32.xlu0 %v930_v35, %s1520_s23 }
 0xfbd   :  { %v905_v37 = vpop.permute.xlu0 %904 }
 0xfbe   :  { %v907_v38 = vmul.f32 %v905_v37, %v889_v26 }
 0xfc0   :  { %957 = vrot.lane.b32.xlu2 %v907_v38, %s1520_s23 }
0x1004   :  { %v933_v39 = vpop.permute.xlu0 %932 }
0x1005   :  { %1260 = vmatmul.msk.f32.vlgmr.msra.gmra.mxu1 %vm261_vm1, %v933_v39  ;;  %1262 = vmatmul.msk.f32.vlgmr.msra.gmra.mxu3 %vm261_vm1, %v933_v39 }
0x101a   :  { %v958_v40 = vpop.permute.xlu2 %957 }
0x101b   :  { %1261 = vmatmul.msk.f32.vlgmr.msra.gmra.mxu2 %vm261_vm1, %v958_v40 }
0x1082   :  { %v953_v43 = vpop.f32.mrf.mxu1 }
0x1083   :  { %v1024_v44 = vadd.f32 %v953_v43, %v187_v42 }
0x1085   :  { %1361 = vtanh.f32 %v1024_v44  ;;  %v1025_v51 = vmul.f32 0.5, %v1024_v44 }
0x1088   :  { %v998_v48 = vpop.f32.mrf.mxu3 }
0x108b   :  { %v1362_v45 = vpop.eup %1361 }
0x108c   :  { %1032 = vrot.lane.b32.xlu1 %v1362_v45, %s1519_s2 }
0x109e   :  { %v978_v46 = vpop.f32.mrf.mxu2 }
0x109f   :  { %v979_v47 = vadd.f32 %v1699_v29, %v978_v46 }
0x10a1   :  { %v1001_v49 = vadd.f32 %v998_v48, %v979_v47  ;;  %v1280_v47 = vld [vmem:[%s1966_s10] ss:$0 sm:$0xff] }
0x10a2   :  { %v1281_v48 = vld [vmem:[%s1967_s11] ss:$0 sm:$0xff] }
0x10a3   :  { %1363 = vtanh.f32 %v1001_v49  ;;  %v1002_v52 = vmul.f32 0.5, %v1001_v49 }
0x10a4   :  { %1365 = vtanh.f32 %v1025_v51 }
0x10a5   :  { %1367 = vtanh.f32 %v1002_v52 }
0x10a9   :  { %v1364_v50 = vpop.eup %1363 }
0x10aa   :  { %1009 = vrot.lane.b32.xlu2 %v1364_v50, %s1519_s2  ;;  %v1366_v53 = vpop.eup %1365 }
0x10ab   :  { %v1027_v3 = vadd.f32 1.0, %v1366_v53  ;;  %v1368_v54 = vpop.eup %1367 }
0x10ac   :  { %v1004_v58 = vadd.f32 1.0, %v1368_v54 }
0x10ad   :  { %v1028_v55 = vmul.f32 0.5, %v1027_v3 }
0x10ae   :  { %v1005_v59 = vmul.f32 0.5, %v1004_v58 }
0x10af   :  { %v1030_v2 = vmul.f32 %v1028_v55, %v924_v17 }
0x10b0   :  { %v1007_v6 = vmul.f32 %v1005_v59, %v901_v23 }
0x10fe   :  { %v1033_v56 = vpop.permute.xlu1 %1032 }
0x10ff   :  { %v1035_v57 = vmul.f32 %v1033_v56, %v1028_v55  ;;  %v1183_v56 = vld [vmem:[#allocation8 + $0x10] sm:$0xff] }
0x1101   :  { %1037 = vrot.lane.b32.xlu0 %v1035_v57, %s1520_s23 }
0x1104   :  { %v1010_v62 = vpop.permute.xlu2 %1009 }
0x1105   :  { %v1012_v63 = vmul.f32 %v1010_v62, %v1005_v59 }
0x1107   :  { %1014 = vrot.lane.b32.xlu1 %v1012_v63, %s1520_s23  ;;  %v1181_v63 = vld [vmem:[#allocation8] sm:$0xff] }
0x1173   :  { %v1038_v4 = vpop.permute.xlu0 %1037 }
0x1174   :  { %v1040_v5 = vadd.f32 %v1038_v4, %v1030_v2 }
0x1176   :  { %1369 = vtanh.f32 %v1040_v5 }
0x1179   :  { %v1015_v60 = vpop.permute.xlu1 %1014 }
0x117a   :  { %v1017_v7 = vadd.f32 %v1015_v60, %v1007_v6 }
0x117c   :  { %v1370_v61 = vpop.eup %1369  ;;  %1371 = vtanh.f32 %v1017_v7 }
0x117d   :  { %1043 = vrot.lane.b32.xlu2 %v1370_v61, %s1519_s2 }
0x1182   :  { %v1372_v0 = vpop.eup %1371 }
0x1183   :  { %1020 = vrot.lane.b32.xlu0 %v1372_v0, %s1519_s2 }
0x11d7   :  { %v1044_v1 = vpop.permute.xlu2 %1043 }
0x11d8   :  { %v1046_v8 = vmul.f32 %v1044_v1, %v1028_v55  ;;  %v1184_v55 = vld [vmem:[#allocation8 + $0x18] sm:$0xff] }
0x11d9   :  { %1206 = vmatpush.msrb.mxu3 %v1184_v55 }
0x11da   :  { %1073 = vrot.lane.b32.xlu1 %v1046_v8, %s1520_s23 }
0x11db   :  { %1207 = vmatpush.msrb.mxu3 %v1183_v56 }
0x11f5   :  { %v1021_v10 = vpop.permute.xlu0 %1020 }
0x11f6   :  { %v1023_v18 = vmul.f32 %v1021_v10, %v1005_v59  ;;  %v1182_v59 = vld [vmem:[#allocation8 + $0x8] sm:$0xff] }
0x11f7   :  { %1208 = vmatpush.msrb.mxu3 %v1182_v59 }
0x11f8   :  { %1048 = vrot.lane.b32.xlu2 %v1023_v18, %s1520_s23 }
0x11f9   :  { %1209 = vmatpush.msrb.mxu3 %v1181_v63 }
0x124c   :  { %v1074_v20 = vpop.permute.xlu1 %1073 }
0x124d   :  { %1264 = vmatmul.msk.f32.vlgmr.msrb.gmra.mxu2 %vm261_vm1, %v1074_v20 }
0x1252   :  { %v1049_v22 = vpop.permute.xlu2 %1048 }
0x1253   :  { %1263 = vmatmul.msk.f32.vlgmr.msrb.gmra.mxu1 %vm261_vm1, %v1049_v22  ;;  %v1282_v22 = vld [vmem:[%s1969_s13] ss:$0 sm:$0xff] }
0x12d0   :  { %v1069_v24 = vpop.f32.mrf.mxu1  ;;  %v1094_v12 = vpop.f32.mrf.mxu2 }
0x12d1   :  { %v1070_v11 = vadd.f32 %v1699_v29, %v1069_v24 }
0x12d3   :  { %v1097_v13 = vadd.f32 %v1094_v12, %v1070_v11 }
0x12d5   :  { %1373 = vtanh.f32 %v1097_v13  ;;  %v1098_v25 = vmul.f32 0.5, %v1097_v13 }
0x12d7   :  { %1375 = vtanh.f32 %v1098_v25 }
0x12db   :  { %v1374_v14 = vpop.eup %1373 }
0x12dc   :  { %1105 = vrot.lane.b32.xlu0 %v1374_v14, %s1519_s2 }
0x12dd   :  { %v1376_v26 = vpop.eup %1375 }
0x12de   :  { %v1100_v27 = vadd.f32 1.0, %v1376_v26 }
0x12e0   :  { %v1101_v29 = vmul.f32 0.5, %v1100_v27 }
0x12e2   :  { %v1103_v31 = vmul.f32 %v1101_v29, %v1017_v7 }
0x12e4   :  { %1121 = vrot.lane.b32.xlu0 %v217_v16, %s1521_s1 }
0x134e   :  { %v1106_v28 = vpop.permute.xlu0 %1105 }
0x134f   :  { %v1108_v30 = vmul.f32 %v1106_v28, %v1101_v29 }
0x1351   :  { %1110 = vrot.lane.b32.xlu1 %v1108_v30, %s1520_s23 }
0x1356   :  { %v1122_v23 = vpop.permute.xlu0 %1121 }
0x13c3   :  { %v1111_v17 = vpop.permute.xlu1 %1110 }
0x13c4   :  { %v1113_v19 = vadd.f32 %v1111_v17, %v1103_v31 }
0x13c6   :  { %1377 = vtanh.f32 %v1113_v19 }
0x13c7   :  { %1379 = vrcp.f32 %v1522_v36 }
0x13cc   :  { %v1378_v21 = vpop.eup %1377 }
0x13cd   :  { %1116 = vrot.lane.b32.xlu2 %v1378_v21, %s1519_s2  ;;  %v1380_v37 = vpop.eup %1379 }
0x13ce   :  { %v1133_v38 = vmul.f32 32.0, %v1380_v37  ;;  %vm1137_vm2 = vweird.f32 %v1380_v37 }
0x13d0   :  { %v1134_v39 = vsub.f32 1.0, %v1133_v38 }
0x13d2   :  { %v1135_v40 = vmul.f32 %v1380_v37, %v1134_v39 }
0x13d4   :  { %v1136_v41 = vadd.f32 %v1380_v37, %v1135_v40 }
0x13d6   :  { %v1138_v42 = vsel %vm1137_vm2, %v1380_v37, %v1136_v41 }
0x1427   :  { %v1117_v9 = vpop.permute.xlu2 %1116 }
0x1428   :  { %v1119_v32 = vmul.f32 %v1117_v9, %v1101_v29 }
0x142a   :  { %v1124_v33 = vadd.f32 %v1122_v23, %v1119_v32 }
0x142c   :  { %1126 = vrot.lane.b32.xlu1 %v1124_v33, %s1520_s23 }
0x149e   :  { %v1127_v34 = vpop.permute.xlu1 %1126 }
0x149f   :  { %v1129_v35 = vsel %vm261_vm1, %v1127_v34, 0.0 }
0x14a0   :  { %1130 = vadd.xlane.f32.xlu2 %v1129_v35 }
0x1513   :  { %v1131_v43 = vpop.xlane.xlu2 %1130 }
0x1514   :  { %v1139_v44 = vmul.f32 %v1138_v42, %v1131_v43 }
0x1516   :  { %v1140_v45 = vsub.f32 %v1124_v33, %v1139_v44 }
0x1518   :  { %v1141_v46 = vmul.f32 %v1140_v45, %v1140_v45 }
0x151a   :  { %1143 = vrot.lane.b32.xlu0 %v1141_v46, %s1520_s23 }
0x1522   :  { %1165 = vrot.lane.b32.xlu0 %v1280_v47, %s1521_s1 }
0x152a   :  { %1172 = vrot.lane.b32.xlu0 %v1281_v48, %s1521_s1 }
0x158c   :  { %v1144_v49 = vpop.permute.xlu0 %1143 }
0x158d   :  { %v1146_v50 = vsel %vm261_vm1, %v1144_v49, 0.0 }
0x158e   :  { %1147 = vadd.xlane.f32.xlu1 %v1146_v50 }
0x1594   :  { %v1166_v58 = vpop.permute.xlu0 %1165 }
0x159c   :  { %v1173_v60 = vpop.permute.xlu0 %1172 }
0x1601   :  { %v1148_v51 = vpop.xlane.xlu1 %1147 }
0x1602   :  { %v1149_v52 = vmul.f32 %v1148_v51, %v1138_v42 }
0x1604   :  { %v1150_v53 = vadd.f32 1e-05, %v1149_v52 }
0x1606   :  { %1381 = vrsqrt.f32 %v1150_v53  ;;  %vm1157_vm4 = vweird.f32 %v1150_v53 }
0x160c   :  { %v1382_v3 = vpop.eup %1381 }
0x160d   :  { %v1152_v54 = vmul.f32 %v1382_v3, %v1150_v53  ;;  %vm1158_vm3 = vweird.f32 %v1382_v3 }
0x160e   :  { %vm1159_vm5 = vmor %vm1157_vm4, %vm1158_vm3 }
0x160f   :  { %v1153_v57 = vmul.f32 %v1382_v3, %v1152_v54 }
0x1611   :  { %v1154_v62 = vmul.f32 0.5, %v1153_v57 }
0x1613   :  { %v1155_v2 = vsub.f32 1.5, %v1154_v62 }
0x1615   :  { %v1156_v4 = vmul.f32 %v1382_v3, %v1155_v2 }
0x1617   :  { %v1160_v5 = vsel %vm1159_vm5, %v1382_v3, %v1156_v4 }
0x1618   :  { %v1161_v6 = vmul.f32 %v1160_v5, %v1140_v45 }
0x161a   :  { %v1168_v7 = vmul.f32 %v1166_v58, %v1161_v6 }
0x161c   :  { %v1175_v61 = vadd.f32 %v1173_v60, %v1168_v7 }
0x161e   :  { %v1176_v0 = vmul.f32 0.5, %v1175_v61 }
0x1620   :  { %1383 = vtanh.f32 %v1176_v0 }
0x1626   :  { %v1384_v1 = vpop.eup %1383 }
0x1627   :  { %v1178_v8 = vadd.f32 1.0, %v1384_v1 }
0x1629   :  { %v1179_v10 = vmul.f32 0.5, %v1178_v8 }
0x162b   :  { %v1180_v18 = vmul.f32 %v1179_v10, %v1175_v61 }
0x162d   :  { %1190 = vrot.lane.b32.xlu0 %v1180_v18, %s1520_s23 }
0x169f   :  { %v1191_v20 = vpop.permute.xlu0 %1190 }
0x16a0   :  { %1265 = vmatmul.msk.f32.vlgmr.msrb.gmra.mxu3 %vm261_vm1, %v1191_v20 }
0x1723   :  { %v1211_v24 = vpop.f32.mrf.mxu3 }
0x1724   :  { %v1212_v11 = vadd.f32 %v1282_v22, %v1211_v24 }
0x1726   :  { %1214 = vst [vmem:[#allocation10] sm:$0xff] %v1212_v11 }
0x1727   :  { %1225 = dma.vmem_to_hbm [thread:$0]  %s1221_s12, 128, %s1223_s5, [#allocation4]  }
0x1728   :  { %1511 = dma.done.wait [#allocation4], 128  }
0x1729   :  { %1512 = vsyncadd [#allocation4], 4294967168 }
0x172a   :  { %1230 = vsyncpa [#allocation3], 1 }
0x172b   :  { %1231 = vsyncpa [#allocation6], 1 }
0x172c   :  { %1232 = vsyncpa [#allocation9], 1 }
0x172d   :  { %1233 = vsyncpa [#allocation4], 1 }

</bundles_post_ra>
